<compile_context>
chip_gen: v5e
topology: v5e:2x2
jax: 0.10.0
libtpu: 0.0.40
codegen_flags: <defaults>
</compile_context>

<pallas_src>
import math
import functools

import jax
import jax.numpy as jnp
from jax.experimental import pallas as pl
from jax.experimental.pallas import tpu as pltpu

_NEG = float(jnp.finfo(jnp.float32).min)


# -----------------------------------------------------------------------------
# Per-graph, per-layer body: SAGE conv + pooling score + exact top-k + gated
# pooled features + masked mean/max readout.  Runs inside the fused kernel.
# -----------------------------------------------------------------------------
def _conv_pool_readout(x, a, m, w_self, w_neigh_pad, b, p, k):
    N, C = x.shape

    # SAGE mean aggregation.  One MXU pass computes both the neighbor sum and
    # the degree (mask appended as an extra feature column -> no (N,N)@(N,1)
    # width-1 matvec).
    xmd = jnp.concatenate([x * m, m], axis=-1)                       # (N, C+1)
    ad = jnp.dot(a, xmd, preferred_element_type=jnp.float32)         # (N, C+1)
    deg = ad[:, C:C + 1]                                             # (N, 1)
    inv_deg = pl.reciprocal(jnp.maximum(deg, 1.0), approx=True)

    # Self + neighbor transform as two small-K matmuls (no [x|agg] lane concat
    # at a non-128 boundary).  w_neigh_pad has a zero last row, so the degree
    # column of `ad` contributes nothing and `ad` feeds the MXU un-sliced.
    h = (jnp.dot(x, w_self, preferred_element_type=jnp.float32)
         + jnp.dot(ad * inv_deg, w_neigh_pad,
                   preferred_element_type=jnp.float32)
         + b)
    h = jnp.maximum(h, 0.0) * m                                      # ReLU+mask

    # Pooling score on the VPU (lane reduce).
    s = jnp.sum(h * p, axis=-1, keepdims=True)                       # (N, 1)

    # Exact top-k as a parallel rank computation (first-occurrence tie-break):
    #   rank_i = #{j : s_j > s_i} + #{j : s_j == s_i and j < i}; keep rank < k.
    # Dead nodes are pushed to -inf and excluded, so new_m is always 0/1 and
    # never selects more than the number of live nodes.
    neg = jnp.float32(_NEG)
    s_live = jnp.where(m > 0, s, neg)                                # (N, 1)
    row_i = jax.lax.broadcasted_iota(jnp.int32, (N, N), 0)
    col_j = jax.lax.broadcasted_iota(jnp.int32, (N, N), 1)
    eye = (row_i == col_j).astype(jnp.float32)
    # Exact lane-major copy of the score column (mul + sublane reduce; no
    # transpose op needed).
    s_row = jnp.sum(eye * s_live, axis=0, keepdims=True)             # (1, N)
    beats = (s_row > s_live) | ((s_row == s_live) & (col_j < row_i))
    rank = jnp.sum(beats.astype(jnp.float32), axis=1, keepdims=True) # (N, 1)
    new_m = ((rank < float(k)) & (m > 0)).astype(jnp.float32)        # (N, 1)

    # Gated pooled node features (input to the next layer).
    g = h * jax.nn.sigmoid(s) * new_m                                # (N, H)

    # Masked mean + max readout, concatenated once.
    cnt = jnp.maximum(jnp.sum(new_m, axis=0, keepdims=True), 1.0)    # (1, 1)
    mean = jnp.sum(g, axis=0, keepdims=True) * pl.reciprocal(cnt, approx=True)
    mx = jnp.max(jnp.where(new_m > 0, g, neg), axis=0, keepdims=True)
    ro = jnp.concatenate([mean, mx], axis=-1)                        # (1, 2H)
    return g, new_m, ro


# -----------------------------------------------------------------------------
# Fully fused kernel: all conv/pool layers + LSTM + lin_lstm + ReLU + lin3.
# One grid step == one graph; adjacency is read once and reused for all layers.
# -----------------------------------------------------------------------------
def _fused_forward_kernel(ks,
                          x_ref, a_ref, w0s_ref, w0n_ref, ws_ref, wn_ref,
                          b_ref, p_ref, wih_ref, whh_ref, bl_ref,
                          wl1_ref, bl1_ref, w3_ref, b3_ref, out_ref):
    L, H = b_ref.shape
    N = a_ref.shape[1]

    a = a_ref[0].astype(jnp.float32)             # bf16 in HBM -> f32 math
    x = x_ref[0]                                 # (N, Cin0)
    m = jnp.ones((N, 1), dtype=jnp.float32)
    b_all = b_ref[...]
    p_all = p_ref[...]

    readouts = []
    for layer in range(L):                       # static, fully unrolled
        if layer == 0:
            w_self = w0s_ref[...]
            w_neigh_pad = w0n_ref[...]
        else:
            w_self = ws_ref[layer - 1]
            w_neigh_pad = wn_ref[layer - 1]
        b = b_all[layer:layer + 1, :]
        p = p_all[layer:layer + 1, :]
        x, m, ro = _conv_pool_readout(x, a, m, w_self, w_neigh_pad, b, p,
                                      ks[layer])
        readouts.append(ro)                      # (1, 2H), stays in VMEM

    # LSTM over the per-layer readouts (PyTorch gate order i, f, g, o).
    wih = wih_ref[...]
    whh = whh_ref[...]
    bl = bl_ref[...]                             # combined b_ih + b_hh
    h = jnp.zeros((1, H), dtype=jnp.float32)
    c = jnp.zeros((1, H), dtype=jnp.float32)
    for t in range(L):
        gates = (jnp.dot(readouts[t], wih, preferred_element_type=jnp.float32)
                 + jnp.dot(h, whh, preferred_element_type=jnp.float32)
                 + bl)
        i_g = jax.nn.sigmoid(gates[:, 0:H])
        f_g = jax.nn.sigmoid(gates[:, H:2 * H])
        g_g = jnp.tanh(gates[:, 2 * H:3 * H])
        o_g = jax.nn.sigmoid(gates[:, 3 * H:4 * H])
        c = f_g * c + i_g * g_g
        h = o_g * jnp.tanh(c)

    y = jnp.maximum(
        jnp.dot(h, wl1_ref[...], preferred_element_type=jnp.float32)
        + bl1_ref[...], 0.0)
    out_ref[0] = (jnp.dot(y, w3_ref[...], preferred_element_type=jnp.float32)
                  + b3_ref[...])


# -----------------------------------------------------------------------------
# Full forward (agg_mode='LSTM', dropout=0 / eval).  conv_layers >= 2.
# -----------------------------------------------------------------------------
def model_sage_lstm_forward(adj, n_feat, params, pool_ratio=0.5):
    B, N, Cin0 = n_feat.shape
    layers = params["convpool"]
    L = len(layers)
    assert L >= 2
    H = layers[0]["b"].shape[1]
    O = params["lin3_w"].shape[1]

    # Static per-layer top-k sizes (nodes kept after each pooling).
    ks, count = [], N
    for _ in range(L):
        count = max(1, int(math.ceil(pool_ratio * count)))
        ks.append(count)

    # Pack layer weights (w_neigh gets a zero pad row, see kernel).
    zrow = jnp.zeros((1, H), dtype=jnp.float32)
    w0s = layers[0]["w_self"]                                         # (Cin0, H)
    w0n = jnp.concatenate([layers[0]["w_neigh"], zrow], axis=0)       # (Cin0+1, H)
    ws = jnp.stack([layers[i]["w_self"] for i in range(1, L)], 0)     # (L-1, H, H)
    wn = jnp.stack([jnp.concatenate([layers[i]["w_neigh"], zrow], 0)
                    for i in range(1, L)], 0)                         # (L-1, H+1, H)
    b_all = jnp.concatenate([layers[i]["b"] for i in range(L)], 0)    # (L, H)
    p_all = jnp.concatenate([layers[i]["p"] for i in range(L)], 0)    # (L, H)

    # 0/1 adjacency is exact in bf16 -> halves the dominant HBM read.
    adj_bf16 = adj.astype(jnp.bfloat16)

    out = pl.pallas_call(
        functools.partial(_fused_forward_kernel, tuple(ks)),
        grid=(B,),
        in_specs=[
            pl.BlockSpec((1, N, Cin0), lambda i: (i, 0, 0)),
            pl.BlockSpec((1, N, N), lambda i: (i, 0, 0)),
            pl.BlockSpec((Cin0, H), lambda i: (0, 0)),
            pl.BlockSpec((Cin0 + 1, H), lambda i: (0, 0)),
            pl.BlockSpec((L - 1, H, H), lambda i: (0, 0, 0)),
            pl.BlockSpec((L - 1, H + 1, H), lambda i: (0, 0, 0)),
            pl.BlockSpec((L, H), lambda i: (0, 0)),
            pl.BlockSpec((L, H), lambda i: (0, 0)),
            pl.BlockSpec((2 * H, 4 * H), lambda i: (0, 0)),
            pl.BlockSpec((H, 4 * H), lambda i: (0, 0)),
            pl.BlockSpec((1, 4 * H), lambda i: (0, 0)),
            pl.BlockSpec((H, H), lambda i: (0, 0)),
            pl.BlockSpec((1, H), lambda i: (0, 0)),
            pl.BlockSpec((H, O), lambda i: (0, 0)),
            pl.BlockSpec((1, O), lambda i: (0, 0)),
        ],
        out_specs=pl.BlockSpec((1, 1, O), lambda i: (i, 0, 0)),
        out_shape=jax.ShapeDtypeStruct((B, 1, O), jnp.float32),
        compiler_params=pltpu.CompilerParams(
            dimension_semantics=("parallel",)),
    )(n_feat, adj_bf16, w0s, w0n, ws, wn, b_all, p_all,
      params["lstm_wih"], params["lstm_whh"], params["lstm_b"],
      params["lin_lstm_w"], params["lin_lstm_b"],
      params["lin3_w"], params["lin3_b"])
    return out[:, 0, :]                                               # (B, O)


# -----------------------------------------------------------------------------
# Deterministic parameter init + driver.
# -----------------------------------------------------------------------------
def init_params(key, in_feat, hid_feat, out_feat, conv_layers):
    def nrm(k, shape, scale=0.1):
        return (scale * jax.random.normal(k, shape)).astype(jnp.float32)

    keys = jax.random.split(key, 4 * conv_layers + 7)
    convpool = []
    for i in range(conv_layers):
        c_in = in_feat if i == 0 else hid_feat
        k0, k1, k2, k3 = keys[4 * i:4 * i + 4]
        convpool.append(dict(
            w_self=nrm(k0, (c_in, hid_feat)),
            w_neigh=nrm(k1, (c_in, hid_feat)),
            b=nrm(k2, (1, hid_feat)),
            p=nrm(k3, (1, hid_feat)),      # pooling-score projection as a row
        ))
    kk = keys[4 * conv_layers:]
    return dict(
        convpool=convpool,
        lstm_wih=nrm(kk[0], (hid_feat * 2, 4 * hid_feat)),
        lstm_whh=nrm(kk[1], (hid_feat, 4 * hid_feat)),
        # single combined bias (= b_ih + b_hh when porting PyTorch weights)
        lstm_b=nrm(kk[2], (1, 4 * hid_feat)),
        lin_lstm_w=nrm(kk[3], (hid_feat, hid_feat)),
        lin_lstm_b=nrm(kk[4], (1, hid_feat)),
        lin3_w=nrm(kk[5], (hid_feat, out_feat)),
        lin3_b=nrm(kk[6], (1, out_feat)),
    )


if __name__ == "__main__":
    B, N = 2, 16                     # batch of graphs, nodes per graph
    in_feat, hid_feat, out_feat = 8, 32, 4
    conv_layers = 3

    key = jax.random.PRNGKey(0)
    k_feat, k_adj, k_par = jax.random.split(key, 3)

    n_feat = jax.random.normal(k_feat, (B, N, in_feat), dtype=jnp.float32)
    # random symmetric adjacency with self-loops
    a = (jax.random.uniform(k_adj, (B, N, N)) < 0.3).astype(jnp.float32)
    adj = jnp.clip(a + jnp.transpose(a, (0, 2, 1)) + jnp.eye(N)[None], 0.0, 1.0)

    params = init_params(k_par, in_feat, hid_feat, out_feat, conv_layers)

    out = model_sage_lstm_forward(adj, n_feat, params, pool_ratio=0.5)
    out = jax.block_until_ready(out)
    assert out.shape == (B, out_feat)
    print("KERNEL_OK")
</pallas_src>

<mosaic_0001>
module attributes {stable_mosaic.version = 11 : i64} {
  func.func @_fused_forward_kernel(%arg0: i32, %arg1: memref<1x16x8xf32, #tpu.memory_space<vmem>>, %arg2: memref<1x16x16xbf16, #tpu.memory_space<vmem>>, %arg3: memref<8x32xf32, #tpu.memory_space<vmem>>, %arg4: memref<9x32xf32, #tpu.memory_space<vmem>>, %arg5: memref<2x32x32xf32, #tpu.memory_space<vmem>>, %arg6: memref<2x33x32xf32, #tpu.memory_space<vmem>>, %arg7: memref<3x32xf32, #tpu.memory_space<vmem>>, %arg8: memref<3x32xf32, #tpu.memory_space<vmem>>, %arg9: memref<64x128xf32, #tpu.memory_space<vmem>>, %arg10: memref<32x128xf32, #tpu.memory_space<vmem>>, %arg11: memref<1x128xf32, #tpu.memory_space<vmem>>, %arg12: memref<32x32xf32, #tpu.memory_space<vmem>>, %arg13: memref<1x32xf32, #tpu.memory_space<vmem>>, %arg14: memref<32x4xf32, #tpu.memory_space<vmem>>, %arg15: memref<1x4xf32, #tpu.memory_space<vmem>>, %arg16: memref<1x1x4xf32, #tpu.memory_space<vmem>>) attributes {dimension_semantics = [#tpu.dimension_semantics<parallel>], iteration_bounds = array<i64: 2>, scalar_prefetch = 0 : i64, scratch_operands = 0 : i64, tpu.core_type = #tpu.core_type<tc>, window_params = [{transform_indices = @transform_0, window_bounds = array<i64: 1, 16, 8>}, {transform_indices = @transform_1, window_bounds = array<i64: 1, 16, 16>}, {pipeline_mode = #tpu.pipeline_mode<synchronous>, transform_indices = @transform_2, window_bounds = array<i64: 8, 32>}, {pipeline_mode = #tpu.pipeline_mode<synchronous>, transform_indices = @transform_3, window_bounds = array<i64: 9, 32>}, {pipeline_mode = #tpu.pipeline_mode<synchronous>, transform_indices = @transform_4, window_bounds = array<i64: 2, 32, 32>}, {pipeline_mode = #tpu.pipeline_mode<synchronous>, transform_indices = @transform_5, window_bounds = array<i64: 2, 33, 32>}, {pipeline_mode = #tpu.pipeline_mode<synchronous>, transform_indices = @transform_6, window_bounds = array<i64: 3, 32>}, {pipeline_mode = #tpu.pipeline_mode<synchronous>, transform_indices = @transform_7, window_bounds = array<i64: 3, 32>}, {pipeline_mode = #tpu.pipeline_mode<synchronous>, transform_indices = @transform_8, window_bounds = array<i64: 64, 128>}, {pipeline_mode = #tpu.pipeline_mode<synchronous>, transform_indices = @transform_9, window_bounds = array<i64: 32, 128>}, {pipeline_mode = #tpu.pipeline_mode<synchronous>, transform_indices = @transform_10, window_bounds = array<i64: 1, 128>}, {pipeline_mode = #tpu.pipeline_mode<synchronous>, transform_indices = @transform_11, window_bounds = array<i64: 32, 32>}, {pipeline_mode = #tpu.pipeline_mode<synchronous>, transform_indices = @transform_12, window_bounds = array<i64: 1, 32>}, {pipeline_mode = #tpu.pipeline_mode<synchronous>, transform_indices = @transform_13, window_bounds = array<i64: 32, 4>}, {pipeline_mode = #tpu.pipeline_mode<synchronous>, transform_indices = @transform_14, window_bounds = array<i64: 1, 4>}, {transform_indices = @transform_15, window_bounds = array<i64: 1, 1, 4>}]} {
    %c0 = arith.constant 0 : index
    %c0_0 = arith.constant 0 : index
    %c0_1 = arith.constant 0 : index
    %0 = vector.load %arg2[%c0, %c0_0, %c0_1] : memref<1x16x16xbf16, #tpu.memory_space<vmem>>, vector<1x16x16xbf16>
    %1 = vector.shape_cast %0 : vector<1x16x16xbf16> to vector<16x16xbf16>
    %2 = arith.extf %1 : vector<16x16xbf16> to vector<16x16xf32>
    %c0_2 = arith.constant 0 : index
    %c0_3 = arith.constant 0 : index
    %c0_4 = arith.constant 0 : index
    %3 = vector.load %arg1[%c0_2, %c0_3, %c0_4] : memref<1x16x8xf32, #tpu.memory_space<vmem>>, vector<1x16x8xf32>
    %4 = vector.shape_cast %3 : vector<1x16x8xf32> to vector<16x8xf32>
    %cst = arith.constant 1.000000e+00 : f32
    %5 = vector.broadcast %cst : f32 to vector<16x1xf32>
    %c0_5 = arith.constant 0 : index
    %c0_6 = arith.constant 0 : index
    %6 = vector.load %arg7[%c0_5, %c0_6] : memref<3x32xf32, #tpu.memory_space<vmem>>, vector<3x32xf32>
    %c0_7 = arith.constant 0 : index
    %c0_8 = arith.constant 0 : index
    %7 = vector.load %arg8[%c0_7, %c0_8] : memref<3x32xf32, #tpu.memory_space<vmem>>, vector<3x32xf32>
    %c0_9 = arith.constant 0 : index
    %c0_10 = arith.constant 0 : index
    %8 = vector.load %arg3[%c0_9, %c0_10] : memref<8x32xf32, #tpu.memory_space<vmem>>, vector<8x32xf32>
    %c0_11 = arith.constant 0 : index
    %c0_12 = arith.constant 0 : index
    %9 = vector.load %arg4[%c0_11, %c0_12] : memref<9x32xf32, #tpu.memory_space<vmem>>, vector<9x32xf32>
    %10 = vector.extract_strided_slice %6 {offsets = [0, 0], sizes = [1, 32], strides = [1, 1]} : vector<3x32xf32> to vector<1x32xf32>
    %11 = vector.extract_strided_slice %7 {offsets = [0, 0], sizes = [1, 32], strides = [1, 1]} : vector<3x32xf32> to vector<1x32xf32>
    %12 = vector.broadcast %5 : vector<16x1xf32> to vector<16x8xf32>
    %13 = arith.mulf %4, %12 : vector<16x8xf32>
    %14 = tpu.concatenate %13, %5 in 1 : vector<16x8xf32>, vector<16x1xf32> -> vector<16x9xf32>
    %cst_13 = arith.constant dense<0.000000e+00> : vector<16x9xf32>
    %15 = tpu.matmul %2, %14, %cst_13 {dimension_numbers = #tpu.dot_dimension_numbers<[1], [0], [0], [1], [0, 0, 1, 1], [], []>} : vector<16x16xf32>, vector<16x9xf32>, vector<16x9xf32> -> vector<16x9xf32>
    %16 = vector.extract_strided_slice %15 {offsets = [0, 8], sizes = [16, 1], strides = [1, 1]} : vector<16x9xf32> to vector<16x1xf32>
    %cst_14 = arith.constant 1.000000e+00 : f32
    %17 = vector.broadcast %cst_14 : f32 to vector<16x1xf32>
    %18 = arith.maximumf %16, %17 : vector<16x1xf32>
    %19 = tpu.reciprocal %18 {approx = true} : vector<16x1xf32> -> vector<16x1xf32>
    %cst_15 = arith.constant dense<0.000000e+00> : vector<16x32xf32>
    %20 = tpu.matmul %4, %8, %cst_15 {dimension_numbers = #tpu.dot_dimension_numbers<[1], [0], [0], [1], [0, 0, 1, 1], [], []>} : vector<16x8xf32>, vector<8x32xf32>, vector<16x32xf32> -> vector<16x32xf32>
    %21 = vector.broadcast %19 : vector<16x1xf32> to vector<16x9xf32>
    %22 = arith.mulf %15, %21 : vector<16x9xf32>
    %cst_16 = arith.constant dense<0.000000e+00> : vector<16x32xf32>
    %23 = tpu.matmul %22, %9, %cst_16 {dimension_numbers = #tpu.dot_dimension_numbers<[1], [0], [0], [1], [0, 0, 1, 1], [], []>} : vector<16x9xf32>, vector<9x32xf32>, vector<16x32xf32> -> vector<16x32xf32>
    %24 = arith.addf %20, %23 : vector<16x32xf32>
    %25 = vector.broadcast %10 : vector<1x32xf32> to vector<16x32xf32>
    %26 = arith.addf %24, %25 : vector<16x32xf32>
    %cst_17 = arith.constant 0.000000e+00 : f32
    %27 = vector.broadcast %cst_17 : f32 to vector<16x32xf32>
    %28 = arith.maximumf %26, %27 : vector<16x32xf32>
    %29 = vector.broadcast %5 : vector<16x1xf32> to vector<16x32xf32>
    %30 = arith.mulf %28, %29 : vector<16x32xf32>
    %31 = vector.broadcast %11 : vector<1x32xf32> to vector<16x32xf32>
    %32 = arith.mulf %30, %31 : vector<16x32xf32>
    %cst_18 = arith.constant dense<0.000000e+00> : vector<16xf32>
    %33 = vector.multi_reduction <add>, %32, %cst_18 [1] : vector<16x32xf32> to vector<16xf32>
    %34 = vector.shape_cast %33 : vector<16xf32> to vector<16x1xf32>
    %cst_19 = arith.constant 0.000000e+00 : f32
    %35 = vector.broadcast %cst_19 : f32 to vector<16x1xf32>
    %36 = arith.cmpf ogt, %5, %35 : vector<16x1xf32>
    %cst_20 = arith.constant -3.40282347E+38 : f32
    %37 = vector.broadcast %cst_20 : f32 to vector<16x1xf32>
    %38 = arith.select %36, %34, %37 : vector<16x1xi1>, vector<16x1xf32>
    %39 = tpu.iota {dimensions = array<i32: 0>} : vector<16x16xi32>
    %40 = tpu.iota {dimensions = array<i32: 1>} : vector<16x16xi32>
    %41 = arith.cmpi eq, %39, %40 : vector<16x16xi32>
    %42 = arith.extui %41 : vector<16x16xi1> to vector<16x16xi32>
    %43 = arith.sitofp %42 : vector<16x16xi32> to vector<16x16xf32>
    %44 = vector.broadcast %38 : vector<16x1xf32> to vector<16x16xf32>
    %45 = arith.mulf %43, %44 : vector<16x16xf32>
    %cst_21 = arith.constant dense<0.000000e+00> : vector<16xf32>
    %46 = vector.multi_reduction <add>, %45, %cst_21 [0] : vector<16x16xf32> to vector<16xf32>
    %47 = vector.shape_cast %46 : vector<16xf32> to vector<1x16xf32>
    %48 = vector.broadcast %47 : vector<1x16xf32> to vector<16x16xf32>
    %49 = vector.broadcast %38 : vector<16x1xf32> to vector<16x16xf32>
    %50 = arith.cmpf ogt, %48, %49 : vector<16x16xf32>
    %51 = vector.broadcast %47 : vector<1x16xf32> to vector<16x16xf32>
    %52 = vector.broadcast %38 : vector<16x1xf32> to vector<16x16xf32>
    %53 = arith.cmpf oeq, %51, %52 : vector<16x16xf32>
    %54 = arith.cmpi slt, %40, %39 : vector<16x16xi32>
    %55 = arith.andi %53, %54 : vector<16x16xi1>
    %56 = arith.ori %50, %55 : vector<16x16xi1>
    %57 = arith.extui %56 : vector<16x16xi1> to vector<16x16xi32>
    %58 = arith.sitofp %57 : vector<16x16xi32> to vector<16x16xf32>
    %cst_22 = arith.constant dense<0.000000e+00> : vector<16xf32>
    %59 = vector.multi_reduction <add>, %58, %cst_22 [1] : vector<16x16xf32> to vector<16xf32>
    %60 = vector.shape_cast %59 : vector<16xf32> to vector<16x1xf32>
    %cst_23 = arith.constant 8.000000e+00 : f32
    %61 = vector.broadcast %cst_23 : f32 to vector<16x1xf32>
    %62 = arith.cmpf olt, %60, %61 : vector<16x1xf32>
    %cst_24 = arith.constant 0.000000e+00 : f32
    %63 = vector.broadcast %cst_24 : f32 to vector<16x1xf32>
    %64 = arith.cmpf ogt, %5, %63 : vector<16x1xf32>
    %65 = arith.andi %62, %64 : vector<16x1xi1>
    %66 = arith.extui %65 : vector<16x1xi1> to vector<16x1xi32>
    %67 = arith.sitofp %66 : vector<16x1xi32> to vector<16x1xf32>
    %68 = arith.negf %34 : vector<16x1xf32>
    %69 = math.exp %68 : vector<16x1xf32>
    %cst_25 = arith.constant 1.000000e+00 : f32
    %70 = vector.broadcast %cst_25 : f32 to vector<16x1xf32>
    %71 = arith.addf %70, %69 : vector<16x1xf32>
    %72 = arith.divf %70, %71 : vector<16x1xf32>
    %73 = vector.broadcast %72 : vector<16x1xf32> to vector<16x32xf32>
    %74 = arith.mulf %30, %73 : vector<16x32xf32>
    %75 = vector.broadcast %67 : vector<16x1xf32> to vector<16x32xf32>
    %76 = arith.mulf %74, %75 : vector<16x32xf32>
    %cst_26 = arith.constant dense<0.000000e+00> : vector<1xf32>
    %77 = vector.multi_reduction <add>, %67, %cst_26 [0] : vector<16x1xf32> to vector<1xf32>
    %78 = vector.shape_cast %77 : vector<1xf32> to vector<1x1xf32>
    %cst_27 = arith.constant 1.000000e+00 : f32
    %79 = vector.broadcast %cst_27 : f32 to vector<1x1xf32>
    %80 = arith.maximumf %78, %79 : vector<1x1xf32>
    %cst_28 = arith.constant dense<0.000000e+00> : vector<32xf32>
    %81 = vector.multi_reduction <add>, %76, %cst_28 [0] : vector<16x32xf32> to vector<32xf32>
    %82 = vector.shape_cast %81 : vector<32xf32> to vector<1x32xf32>
    %83 = tpu.reciprocal %80 {approx = true} : vector<1x1xf32> -> vector<1x1xf32>
    %84 = vector.broadcast %83 : vector<1x1xf32> to vector<1x32xf32>
    %85 = arith.mulf %82, %84 : vector<1x32xf32>
    %cst_29 = arith.constant 0.000000e+00 : f32
    %86 = vector.broadcast %cst_29 : f32 to vector<16x1xf32>
    %87 = arith.cmpf ogt, %67, %86 : vector<16x1xf32>
    %cst_30 = arith.constant -3.40282347E+38 : f32
    %88 = vector.shape_cast %87 : vector<16x1xi1> to vector<16x1xi1>
    %89 = vector.broadcast %88 : vector<16x1xi1> to vector<16x32xi1>
    %90 = vector.broadcast %cst_30 : f32 to vector<16x32xf32>
    %91 = arith.select %89, %76, %90 : vector<16x32xi1>, vector<16x32xf32>
    %cst_31 = arith.constant dense<0xFF800000> : vector<32xf32>
    %92 = vector.multi_reduction <maximumf>, %91, %cst_31 [0] : vector<16x32xf32> to vector<32xf32>
    %93 = vector.shape_cast %92 : vector<32xf32> to vector<1x32xf32>
    %94 = tpu.concatenate %85, %93 in 1 : vector<1x32xf32>, vector<1x32xf32> -> vector<1x64xf32>
    %c0_32 = arith.constant 0 : index
    %c0_33 = arith.constant 0 : index
    %c0_34 = arith.constant 0 : index
    %95 = vector.load %arg5[%c0_32, %c0_33, %c0_34] : memref<2x32x32xf32, #tpu.memory_space<vmem>>, vector<1x32x32xf32>
    %96 = vector.shape_cast %95 : vector<1x32x32xf32> to vector<32x32xf32>
    %c0_35 = arith.constant 0 : index
    %c0_36 = arith.constant 0 : index
    %c0_37 = arith.constant 0 : index
    %97 = vector.load %arg6[%c0_35, %c0_36, %c0_37] : memref<2x33x32xf32, #tpu.memory_space<vmem>>, vector<1x33x32xf32>
    %98 = vector.shape_cast %97 : vector<1x33x32xf32> to vector<33x32xf32>
    %99 = vector.extract_strided_slice %6 {offsets = [1, 0], sizes = [1, 32], strides = [1, 1]} : vector<3x32xf32> to vector<1x32xf32>
    %100 = vector.extract_strided_slice %7 {offsets = [1, 0], sizes = [1, 32], strides = [1, 1]} : vector<3x32xf32> to vector<1x32xf32>
    %101 = vector.broadcast %67 : vector<16x1xf32> to vector<16x32xf32>
    %102 = arith.mulf %76, %101 : vector<16x32xf32>
    %103 = tpu.concatenate %102, %67 in 1 : vector<16x32xf32>, vector<16x1xf32> -> vector<16x33xf32>
    %cst_38 = arith.constant dense<0.000000e+00> : vector<16x33xf32>
    %104 = tpu.matmul %2, %103, %cst_38 {dimension_numbers = #tpu.dot_dimension_numbers<[1], [0], [0], [1], [0, 0, 1, 1], [], []>} : vector<16x16xf32>, vector<16x33xf32>, vector<16x33xf32> -> vector<16x33xf32>
    %105 = vector.extract_strided_slice %104 {offsets = [0, 32], sizes = [16, 1], strides = [1, 1]} : vector<16x33xf32> to vector<16x1xf32>
    %cst_39 = arith.constant 1.000000e+00 : f32
    %106 = vector.broadcast %cst_39 : f32 to vector<16x1xf32>
    %107 = arith.maximumf %105, %106 : vector<16x1xf32>
    %108 = tpu.reciprocal %107 {approx = true} : vector<16x1xf32> -> vector<16x1xf32>
    %cst_40 = arith.constant dense<0.000000e+00> : vector<16x32xf32>
    %109 = tpu.matmul %76, %96, %cst_40 {dimension_numbers = #tpu.dot_dimension_numbers<[1], [0], [0], [1], [0, 0, 1, 1], [], []>} : vector<16x32xf32>, vector<32x32xf32>, vector<16x32xf32> -> vector<16x32xf32>
    %110 = vector.broadcast %108 : vector<16x1xf32> to vector<16x33xf32>
    %111 = arith.mulf %104, %110 : vector<16x33xf32>
    %cst_41 = arith.constant dense<0.000000e+00> : vector<16x32xf32>
    %112 = tpu.matmul %111, %98, %cst_41 {dimension_numbers = #tpu.dot_dimension_numbers<[1], [0], [0], [1], [0, 0, 1, 1], [], []>} : vector<16x33xf32>, vector<33x32xf32>, vector<16x32xf32> -> vector<16x32xf32>
    %113 = arith.addf %109, %112 : vector<16x32xf32>
    %114 = vector.broadcast %99 : vector<1x32xf32> to vector<16x32xf32>
    %115 = arith.addf %113, %114 : vector<16x32xf32>
    %cst_42 = arith.constant 0.000000e+00 : f32
    %116 = vector.broadcast %cst_42 : f32 to vector<16x32xf32>
    %117 = arith.maximumf %115, %116 : vector<16x32xf32>
    %118 = vector.broadcast %67 : vector<16x1xf32> to vector<16x32xf32>
    %119 = arith.mulf %117, %118 : vector<16x32xf32>
    %120 = vector.broadcast %100 : vector<1x32xf32> to vector<16x32xf32>
    %121 = arith.mulf %119, %120 : vector<16x32xf32>
    %cst_43 = arith.constant dense<0.000000e+00> : vector<16xf32>
    %122 = vector.multi_reduction <add>, %121, %cst_43 [1] : vector<16x32xf32> to vector<16xf32>
    %123 = vector.shape_cast %122 : vector<16xf32> to vector<16x1xf32>
    %cst_44 = arith.constant 0.000000e+00 : f32
    %124 = vector.broadcast %cst_44 : f32 to vector<16x1xf32>
    %125 = arith.cmpf ogt, %67, %124 : vector<16x1xf32>
    %cst_45 = arith.constant -3.40282347E+38 : f32
    %126 = vector.broadcast %cst_45 : f32 to vector<16x1xf32>
    %127 = arith.select %125, %123, %126 : vector<16x1xi1>, vector<16x1xf32>
    %128 = tpu.iota {dimensions = array<i32: 0>} : vector<16x16xi32>
    %129 = tpu.iota {dimensions = array<i32: 1>} : vector<16x16xi32>
    %130 = arith.cmpi eq, %128, %129 : vector<16x16xi32>
    %131 = arith.extui %130 : vector<16x16xi1> to vector<16x16xi32>
    %132 = arith.sitofp %131 : vector<16x16xi32> to vector<16x16xf32>
    %133 = vector.broadcast %127 : vector<16x1xf32> to vector<16x16xf32>
    %134 = arith.mulf %132, %133 : vector<16x16xf32>
    %cst_46 = arith.constant dense<0.000000e+00> : vector<16xf32>
    %135 = vector.multi_reduction <add>, %134, %cst_46 [0] : vector<16x16xf32> to vector<16xf32>
    %136 = vector.shape_cast %135 : vector<16xf32> to vector<1x16xf32>
    %137 = vector.broadcast %136 : vector<1x16xf32> to vector<16x16xf32>
    %138 = vector.broadcast %127 : vector<16x1xf32> to vector<16x16xf32>
    %139 = arith.cmpf ogt, %137, %138 : vector<16x16xf32>
    %140 = vector.broadcast %136 : vector<1x16xf32> to vector<16x16xf32>
    %141 = vector.broadcast %127 : vector<16x1xf32> to vector<16x16xf32>
    %142 = arith.cmpf oeq, %140, %141 : vector<16x16xf32>
    %143 = arith.cmpi slt, %129, %128 : vector<16x16xi32>
    %144 = arith.andi %142, %143 : vector<16x16xi1>
    %145 = arith.ori %139, %144 : vector<16x16xi1>
    %146 = arith.extui %145 : vector<16x16xi1> to vector<16x16xi32>
    %147 = arith.sitofp %146 : vector<16x16xi32> to vector<16x16xf32>
    %cst_47 = arith.constant dense<0.000000e+00> : vector<16xf32>
    %148 = vector.multi_reduction <add>, %147, %cst_47 [1] : vector<16x16xf32> to vector<16xf32>
    %149 = vector.shape_cast %148 : vector<16xf32> to vector<16x1xf32>
    %cst_48 = arith.constant 4.000000e+00 : f32
    %150 = vector.broadcast %cst_48 : f32 to vector<16x1xf32>
    %151 = arith.cmpf olt, %149, %150 : vector<16x1xf32>
    %cst_49 = arith.constant 0.000000e+00 : f32
    %152 = vector.broadcast %cst_49 : f32 to vector<16x1xf32>
    %153 = arith.cmpf ogt, %67, %152 : vector<16x1xf32>
    %154 = arith.andi %151, %153 : vector<16x1xi1>
    %155 = arith.extui %154 : vector<16x1xi1> to vector<16x1xi32>
    %156 = arith.sitofp %155 : vector<16x1xi32> to vector<16x1xf32>
    %157 = arith.negf %123 : vector<16x1xf32>
    %158 = math.exp %157 : vector<16x1xf32>
    %cst_50 = arith.constant 1.000000e+00 : f32
    %159 = vector.broadcast %cst_50 : f32 to vector<16x1xf32>
    %160 = arith.addf %159, %158 : vector<16x1xf32>
    %161 = arith.divf %159, %160 : vector<16x1xf32>
    %162 = vector.broadcast %161 : vector<16x1xf32> to vector<16x32xf32>
    %163 = arith.mulf %119, %162 : vector<16x32xf32>
    %164 = vector.broadcast %156 : vector<16x1xf32> to vector<16x32xf32>
    %165 = arith.mulf %163, %164 : vector<16x32xf32>
    %cst_51 = arith.constant dense<0.000000e+00> : vector<1xf32>
    %166 = vector.multi_reduction <add>, %156, %cst_51 [0] : vector<16x1xf32> to vector<1xf32>
    %167 = vector.shape_cast %166 : vector<1xf32> to vector<1x1xf32>
    %cst_52 = arith.constant 1.000000e+00 : f32
    %168 = vector.broadcast %cst_52 : f32 to vector<1x1xf32>
    %169 = arith.maximumf %167, %168 : vector<1x1xf32>
    %cst_53 = arith.constant dense<0.000000e+00> : vector<32xf32>
    %170 = vector.multi_reduction <add>, %165, %cst_53 [0] : vector<16x32xf32> to vector<32xf32>
    %171 = vector.shape_cast %170 : vector<32xf32> to vector<1x32xf32>
    %172 = tpu.reciprocal %169 {approx = true} : vector<1x1xf32> -> vector<1x1xf32>
    %173 = vector.broadcast %172 : vector<1x1xf32> to vector<1x32xf32>
    %174 = arith.mulf %171, %173 : vector<1x32xf32>
    %cst_54 = arith.constant 0.000000e+00 : f32
    %175 = vector.broadcast %cst_54 : f32 to vector<16x1xf32>
    %176 = arith.cmpf ogt, %156, %175 : vector<16x1xf32>
    %cst_55 = arith.constant -3.40282347E+38 : f32
    %177 = vector.shape_cast %176 : vector<16x1xi1> to vector<16x1xi1>
    %178 = vector.broadcast %177 : vector<16x1xi1> to vector<16x32xi1>
    %179 = vector.broadcast %cst_55 : f32 to vector<16x32xf32>
    %180 = arith.select %178, %165, %179 : vector<16x32xi1>, vector<16x32xf32>
    %cst_56 = arith.constant dense<0xFF800000> : vector<32xf32>
    %181 = vector.multi_reduction <maximumf>, %180, %cst_56 [0] : vector<16x32xf32> to vector<32xf32>
    %182 = vector.shape_cast %181 : vector<32xf32> to vector<1x32xf32>
    %183 = tpu.concatenate %174, %182 in 1 : vector<1x32xf32>, vector<1x32xf32> -> vector<1x64xf32>
    %c1 = arith.constant 1 : index
    %c0_57 = arith.constant 0 : index
    %c0_58 = arith.constant 0 : index
    %184 = vector.load %arg5[%c1, %c0_57, %c0_58] : memref<2x32x32xf32, #tpu.memory_space<vmem>>, vector<1x32x32xf32>
    %185 = vector.shape_cast %184 : vector<1x32x32xf32> to vector<32x32xf32>
    %c1_59 = arith.constant 1 : index
    %c0_60 = arith.constant 0 : index
    %c0_61 = arith.constant 0 : index
    %186 = vector.load %arg6[%c1_59, %c0_60, %c0_61] : memref<2x33x32xf32, #tpu.memory_space<vmem>>, vector<1x33x32xf32>
    %187 = vector.shape_cast %186 : vector<1x33x32xf32> to vector<33x32xf32>
    %188 = vector.extract_strided_slice %6 {offsets = [2, 0], sizes = [1, 32], strides = [1, 1]} : vector<3x32xf32> to vector<1x32xf32>
    %189 = vector.extract_strided_slice %7 {offsets = [2, 0], sizes = [1, 32], strides = [1, 1]} : vector<3x32xf32> to vector<1x32xf32>
    %190 = vector.broadcast %156 : vector<16x1xf32> to vector<16x32xf32>
    %191 = arith.mulf %165, %190 : vector<16x32xf32>
    %192 = tpu.concatenate %191, %156 in 1 : vector<16x32xf32>, vector<16x1xf32> -> vector<16x33xf32>
    %cst_62 = arith.constant dense<0.000000e+00> : vector<16x33xf32>
    %193 = tpu.matmul %2, %192, %cst_62 {dimension_numbers = #tpu.dot_dimension_numbers<[1], [0], [0], [1], [0, 0, 1, 1], [], []>} : vector<16x16xf32>, vector<16x33xf32>, vector<16x33xf32> -> vector<16x33xf32>
    %194 = vector.extract_strided_slice %193 {offsets = [0, 32], sizes = [16, 1], strides = [1, 1]} : vector<16x33xf32> to vector<16x1xf32>
    %cst_63 = arith.constant 1.000000e+00 : f32
    %195 = vector.broadcast %cst_63 : f32 to vector<16x1xf32>
    %196 = arith.maximumf %194, %195 : vector<16x1xf32>
    %197 = tpu.reciprocal %196 {approx = true} : vector<16x1xf32> -> vector<16x1xf32>
    %cst_64 = arith.constant dense<0.000000e+00> : vector<16x32xf32>
    %198 = tpu.matmul %165, %185, %cst_64 {dimension_numbers = #tpu.dot_dimension_numbers<[1], [0], [0], [1], [0, 0, 1, 1], [], []>} : vector<16x32xf32>, vector<32x32xf32>, vector<16x32xf32> -> vector<16x32xf32>
    %199 = vector.broadcast %197 : vector<16x1xf32> to vector<16x33xf32>
    %200 = arith.mulf %193, %199 : vector<16x33xf32>
    %cst_65 = arith.constant dense<0.000000e+00> : vector<16x32xf32>
    %201 = tpu.matmul %200, %187, %cst_65 {dimension_numbers = #tpu.dot_dimension_numbers<[1], [0], [0], [1], [0, 0, 1, 1], [], []>} : vector<16x33xf32>, vector<33x32xf32>, vector<16x32xf32> -> vector<16x32xf32>
    %202 = arith.addf %198, %201 : vector<16x32xf32>
    %203 = vector.broadcast %188 : vector<1x32xf32> to vector<16x32xf32>
    %204 = arith.addf %202, %203 : vector<16x32xf32>
    %cst_66 = arith.constant 0.000000e+00 : f32
    %205 = vector.broadcast %cst_66 : f32 to vector<16x32xf32>
    %206 = arith.maximumf %204, %205 : vector<16x32xf32>
    %207 = vector.broadcast %156 : vector<16x1xf32> to vector<16x32xf32>
    %208 = arith.mulf %206, %207 : vector<16x32xf32>
    %209 = vector.broadcast %189 : vector<1x32xf32> to vector<16x32xf32>
    %210 = arith.mulf %208, %209 : vector<16x32xf32>
    %cst_67 = arith.constant dense<0.000000e+00> : vector<16xf32>
    %211 = vector.multi_reduction <add>, %210, %cst_67 [1] : vector<16x32xf32> to vector<16xf32>
    %212 = vector.shape_cast %211 : vector<16xf32> to vector<16x1xf32>
    %cst_68 = arith.constant 0.000000e+00 : f32
    %213 = vector.broadcast %cst_68 : f32 to vector<16x1xf32>
    %214 = arith.cmpf ogt, %156, %213 : vector<16x1xf32>
    %cst_69 = arith.constant -3.40282347E+38 : f32
    %215 = vector.broadcast %cst_69 : f32 to vector<16x1xf32>
    %216 = arith.select %214, %212, %215 : vector<16x1xi1>, vector<16x1xf32>
    %217 = tpu.iota {dimensions = array<i32: 0>} : vector<16x16xi32>
    %218 = tpu.iota {dimensions = array<i32: 1>} : vector<16x16xi32>
    %219 = arith.cmpi eq, %217, %218 : vector<16x16xi32>
    %220 = arith.extui %219 : vector<16x16xi1> to vector<16x16xi32>
    %221 = arith.sitofp %220 : vector<16x16xi32> to vector<16x16xf32>
    %222 = vector.broadcast %216 : vector<16x1xf32> to vector<16x16xf32>
    %223 = arith.mulf %221, %222 : vector<16x16xf32>
    %cst_70 = arith.constant dense<0.000000e+00> : vector<16xf32>
    %224 = vector.multi_reduction <add>, %223, %cst_70 [0] : vector<16x16xf32> to vector<16xf32>
    %225 = vector.shape_cast %224 : vector<16xf32> to vector<1x16xf32>
    %226 = vector.broadcast %225 : vector<1x16xf32> to vector<16x16xf32>
    %227 = vector.broadcast %216 : vector<16x1xf32> to vector<16x16xf32>
    %228 = arith.cmpf ogt, %226, %227 : vector<16x16xf32>
    %229 = vector.broadcast %225 : vector<1x16xf32> to vector<16x16xf32>
    %230 = vector.broadcast %216 : vector<16x1xf32> to vector<16x16xf32>
    %231 = arith.cmpf oeq, %229, %230 : vector<16x16xf32>
    %232 = arith.cmpi slt, %218, %217 : vector<16x16xi32>
    %233 = arith.andi %231, %232 : vector<16x16xi1>
    %234 = arith.ori %228, %233 : vector<16x16xi1>
    %235 = arith.extui %234 : vector<16x16xi1> to vector<16x16xi32>
    %236 = arith.sitofp %235 : vector<16x16xi32> to vector<16x16xf32>
    %cst_71 = arith.constant dense<0.000000e+00> : vector<16xf32>
    %237 = vector.multi_reduction <add>, %236, %cst_71 [1] : vector<16x16xf32> to vector<16xf32>
    %238 = vector.shape_cast %237 : vector<16xf32> to vector<16x1xf32>
    %cst_72 = arith.constant 2.000000e+00 : f32
    %239 = vector.broadcast %cst_72 : f32 to vector<16x1xf32>
    %240 = arith.cmpf olt, %238, %239 : vector<16x1xf32>
    %cst_73 = arith.constant 0.000000e+00 : f32
    %241 = vector.broadcast %cst_73 : f32 to vector<16x1xf32>
    %242 = arith.cmpf ogt, %156, %241 : vector<16x1xf32>
    %243 = arith.andi %240, %242 : vector<16x1xi1>
    %244 = arith.extui %243 : vector<16x1xi1> to vector<16x1xi32>
    %245 = arith.sitofp %244 : vector<16x1xi32> to vector<16x1xf32>
    %246 = arith.negf %212 : vector<16x1xf32>
    %247 = math.exp %246 : vector<16x1xf32>
    %cst_74 = arith.constant 1.000000e+00 : f32
    %248 = vector.broadcast %cst_74 : f32 to vector<16x1xf32>
    %249 = arith.addf %248, %247 : vector<16x1xf32>
    %250 = arith.divf %248, %249 : vector<16x1xf32>
    %251 = vector.broadcast %250 : vector<16x1xf32> to vector<16x32xf32>
    %252 = arith.mulf %208, %251 : vector<16x32xf32>
    %253 = vector.broadcast %245 : vector<16x1xf32> to vector<16x32xf32>
    %254 = arith.mulf %252, %253 : vector<16x32xf32>
    %cst_75 = arith.constant dense<0.000000e+00> : vector<1xf32>
    %255 = vector.multi_reduction <add>, %245, %cst_75 [0] : vector<16x1xf32> to vector<1xf32>
    %256 = vector.shape_cast %255 : vector<1xf32> to vector<1x1xf32>
    %cst_76 = arith.constant 1.000000e+00 : f32
    %257 = vector.broadcast %cst_76 : f32 to vector<1x1xf32>
    %258 = arith.maximumf %256, %257 : vector<1x1xf32>
    %cst_77 = arith.constant dense<0.000000e+00> : vector<32xf32>
    %259 = vector.multi_reduction <add>, %254, %cst_77 [0] : vector<16x32xf32> to vector<32xf32>
    %260 = vector.shape_cast %259 : vector<32xf32> to vector<1x32xf32>
    %261 = tpu.reciprocal %258 {approx = true} : vector<1x1xf32> -> vector<1x1xf32>
    %262 = vector.broadcast %261 : vector<1x1xf32> to vector<1x32xf32>
    %263 = arith.mulf %260, %262 : vector<1x32xf32>
    %cst_78 = arith.constant 0.000000e+00 : f32
    %264 = vector.broadcast %cst_78 : f32 to vector<16x1xf32>
    %265 = arith.cmpf ogt, %245, %264 : vector<16x1xf32>
    %cst_79 = arith.constant -3.40282347E+38 : f32
    %266 = vector.shape_cast %265 : vector<16x1xi1> to vector<16x1xi1>
    %267 = vector.broadcast %266 : vector<16x1xi1> to vector<16x32xi1>
    %268 = vector.broadcast %cst_79 : f32 to vector<16x32xf32>
    %269 = arith.select %267, %254, %268 : vector<16x32xi1>, vector<16x32xf32>
    %cst_80 = arith.constant dense<0xFF800000> : vector<32xf32>
    %270 = vector.multi_reduction <maximumf>, %269, %cst_80 [0] : vector<16x32xf32> to vector<32xf32>
    %271 = vector.shape_cast %270 : vector<32xf32> to vector<1x32xf32>
    %272 = tpu.concatenate %263, %271 in 1 : vector<1x32xf32>, vector<1x32xf32> -> vector<1x64xf32>
    %c0_81 = arith.constant 0 : index
    %c0_82 = arith.constant 0 : index
    %273 = vector.load %arg9[%c0_81, %c0_82] : memref<64x128xf32, #tpu.memory_space<vmem>>, vector<64x128xf32>
    %c0_83 = arith.constant 0 : index
    %c0_84 = arith.constant 0 : index
    %274 = vector.load %arg10[%c0_83, %c0_84] : memref<32x128xf32, #tpu.memory_space<vmem>>, vector<32x128xf32>
    %c0_85 = arith.constant 0 : index
    %c0_86 = arith.constant 0 : index
    %275 = vector.load %arg11[%c0_85, %c0_86] : memref<1x128xf32, #tpu.memory_space<vmem>>, vector<1x128xf32>
    %cst_87 = arith.constant 0.000000e+00 : f32
    %276 = vector.broadcast %cst_87 : f32 to vector<1x32xf32>
    %cst_88 = arith.constant 0.000000e+00 : f32
    %277 = vector.broadcast %cst_88 : f32 to vector<1x32xf32>
    %cst_89 = arith.constant dense<0.000000e+00> : vector<1x128xf32>
    %278 = tpu.matmul %94, %273, %cst_89 {dimension_numbers = #tpu.dot_dimension_numbers<[1], [0], [0], [1], [0, 0, 1, 1], [], []>} : vector<1x64xf32>, vector<64x128xf32>, vector<1x128xf32> -> vector<1x128xf32>
    %cst_90 = arith.constant dense<0.000000e+00> : vector<1x128xf32>
    %279 = tpu.matmul %276, %274, %cst_90 {dimension_numbers = #tpu.dot_dimension_numbers<[1], [0], [0], [1], [0, 0, 1, 1], [], []>} : vector<1x32xf32>, vector<32x128xf32>, vector<1x128xf32> -> vector<1x128xf32>
    %280 = arith.addf %278, %279 : vector<1x128xf32>
    %281 = arith.addf %280, %275 : vector<1x128xf32>
    %282 = vector.extract_strided_slice %281 {offsets = [0, 0], sizes = [1, 32], strides = [1, 1]} : vector<1x128xf32> to vector<1x32xf32>
    %283 = arith.negf %282 : vector<1x32xf32>
    %284 = math.exp %283 : vector<1x32xf32>
    %cst_91 = arith.constant 1.000000e+00 : f32
    %285 = vector.broadcast %cst_91 : f32 to vector<1x32xf32>
    %286 = arith.addf %285, %284 : vector<1x32xf32>
    %287 = arith.divf %285, %286 : vector<1x32xf32>
    %288 = vector.extract_strided_slice %281 {offsets = [0, 32], sizes = [1, 32], strides = [1, 1]} : vector<1x128xf32> to vector<1x32xf32>
    %289 = arith.negf %288 : vector<1x32xf32>
    %290 = math.exp %289 : vector<1x32xf32>
    %cst_92 = arith.constant 1.000000e+00 : f32
    %291 = vector.broadcast %cst_92 : f32 to vector<1x32xf32>
    %292 = arith.addf %291, %290 : vector<1x32xf32>
    %293 = arith.divf %291, %292 : vector<1x32xf32>
    %294 = vector.extract_strided_slice %281 {offsets = [0, 64], sizes = [1, 32], strides = [1, 1]} : vector<1x128xf32> to vector<1x32xf32>
    %295 = math.tanh %294 : vector<1x32xf32>
    %296 = vector.extract_strided_slice %281 {offsets = [0, 96], sizes = [1, 32], strides = [1, 1]} : vector<1x128xf32> to vector<1x32xf32>
    %297 = arith.negf %296 : vector<1x32xf32>
    %298 = math.exp %297 : vector<1x32xf32>
    %cst_93 = arith.constant 1.000000e+00 : f32
    %299 = vector.broadcast %cst_93 : f32 to vector<1x32xf32>
    %300 = arith.addf %299, %298 : vector<1x32xf32>
    %301 = arith.divf %299, %300 : vector<1x32xf32>
    %302 = arith.mulf %293, %277 : vector<1x32xf32>
    %303 = arith.mulf %287, %295 : vector<1x32xf32>
    %304 = arith.addf %302, %303 : vector<1x32xf32>
    %305 = math.tanh %304 : vector<1x32xf32>
    %306 = arith.mulf %301, %305 : vector<1x32xf32>
    %cst_94 = arith.constant dense<0.000000e+00> : vector<1x128xf32>
    %307 = tpu.matmul %183, %273, %cst_94 {dimension_numbers = #tpu.dot_dimension_numbers<[1], [0], [0], [1], [0, 0, 1, 1], [], []>} : vector<1x64xf32>, vector<64x128xf32>, vector<1x128xf32> -> vector<1x128xf32>
    %cst_95 = arith.constant dense<0.000000e+00> : vector<1x128xf32>
    %308 = tpu.matmul %306, %274, %cst_95 {dimension_numbers = #tpu.dot_dimension_numbers<[1], [0], [0], [1], [0, 0, 1, 1], [], []>} : vector<1x32xf32>, vector<32x128xf32>, vector<1x128xf32> -> vector<1x128xf32>
    %309 = arith.addf %307, %308 : vector<1x128xf32>
    %310 = arith.addf %309, %275 : vector<1x128xf32>
    %311 = vector.extract_strided_slice %310 {offsets = [0, 0], sizes = [1, 32], strides = [1, 1]} : vector<1x128xf32> to vector<1x32xf32>
    %312 = arith.negf %311 : vector<1x32xf32>
    %313 = math.exp %312 : vector<1x32xf32>
    %cst_96 = arith.constant 1.000000e+00 : f32
    %314 = vector.broadcast %cst_96 : f32 to vector<1x32xf32>
    %315 = arith.addf %314, %313 : vector<1x32xf32>
    %316 = arith.divf %314, %315 : vector<1x32xf32>
    %317 = vector.extract_strided_slice %310 {offsets = [0, 32], sizes = [1, 32], strides = [1, 1]} : vector<1x128xf32> to vector<1x32xf32>
    %318 = arith.negf %317 : vector<1x32xf32>
    %319 = math.exp %318 : vector<1x32xf32>
    %cst_97 = arith.constant 1.000000e+00 : f32
    %320 = vector.broadcast %cst_97 : f32 to vector<1x32xf32>
    %321 = arith.addf %320, %319 : vector<1x32xf32>
    %322 = arith.divf %320, %321 : vector<1x32xf32>
    %323 = vector.extract_strided_slice %310 {offsets = [0, 64], sizes = [1, 32], strides = [1, 1]} : vector<1x128xf32> to vector<1x32xf32>
    %324 = math.tanh %323 : vector<1x32xf32>
    %325 = vector.extract_strided_slice %310 {offsets = [0, 96], sizes = [1, 32], strides = [1, 1]} : vector<1x128xf32> to vector<1x32xf32>
    %326 = arith.negf %325 : vector<1x32xf32>
    %327 = math.exp %326 : vector<1x32xf32>
    %cst_98 = arith.constant 1.000000e+00 : f32
    %328 = vector.broadcast %cst_98 : f32 to vector<1x32xf32>
    %329 = arith.addf %328, %327 : vector<1x32xf32>
    %330 = arith.divf %328, %329 : vector<1x32xf32>
    %331 = arith.mulf %322, %304 : vector<1x32xf32>
    %332 = arith.mulf %316, %324 : vector<1x32xf32>
    %333 = arith.addf %331, %332 : vector<1x32xf32>
    %334 = math.tanh %333 : vector<1x32xf32>
    %335 = arith.mulf %330, %334 : vector<1x32xf32>
    %cst_99 = arith.constant dense<0.000000e+00> : vector<1x128xf32>
    %336 = tpu.matmul %272, %273, %cst_99 {dimension_numbers = #tpu.dot_dimension_numbers<[1], [0], [0], [1], [0, 0, 1, 1], [], []>} : vector<1x64xf32>, vector<64x128xf32>, vector<1x128xf32> -> vector<1x128xf32>
    %cst_100 = arith.constant dense<0.000000e+00> : vector<1x128xf32>
    %337 = tpu.matmul %335, %274, %cst_100 {dimension_numbers = #tpu.dot_dimension_numbers<[1], [0], [0], [1], [0, 0, 1, 1], [], []>} : vector<1x32xf32>, vector<32x128xf32>, vector<1x128xf32> -> vector<1x128xf32>
    %338 = arith.addf %336, %337 : vector<1x128xf32>
    %339 = arith.addf %338, %275 : vector<1x128xf32>
    %340 = vector.extract_strided_slice %339 {offsets = [0, 0], sizes = [1, 32], strides = [1, 1]} : vector<1x128xf32> to vector<1x32xf32>
    %341 = arith.negf %340 : vector<1x32xf32>
    %342 = math.exp %341 : vector<1x32xf32>
    %cst_101 = arith.constant 1.000000e+00 : f32
    %343 = vector.broadcast %cst_101 : f32 to vector<1x32xf32>
    %344 = arith.addf %343, %342 : vector<1x32xf32>
    %345 = arith.divf %343, %344 : vector<1x32xf32>
    %346 = vector.extract_strided_slice %339 {offsets = [0, 32], sizes = [1, 32], strides = [1, 1]} : vector<1x128xf32> to vector<1x32xf32>
    %347 = arith.negf %346 : vector<1x32xf32>
    %348 = math.exp %347 : vector<1x32xf32>
    %cst_102 = arith.constant 1.000000e+00 : f32
    %349 = vector.broadcast %cst_102 : f32 to vector<1x32xf32>
    %350 = arith.addf %349, %348 : vector<1x32xf32>
    %351 = arith.divf %349, %350 : vector<1x32xf32>
    %352 = vector.extract_strided_slice %339 {offsets = [0, 64], sizes = [1, 32], strides = [1, 1]} : vector<1x128xf32> to vector<1x32xf32>
    %353 = math.tanh %352 : vector<1x32xf32>
    %354 = vector.extract_strided_slice %339 {offsets = [0, 96], sizes = [1, 32], strides = [1, 1]} : vector<1x128xf32> to vector<1x32xf32>
    %355 = arith.negf %354 : vector<1x32xf32>
    %356 = math.exp %355 : vector<1x32xf32>
    %cst_103 = arith.constant 1.000000e+00 : f32
    %357 = vector.broadcast %cst_103 : f32 to vector<1x32xf32>
    %358 = arith.addf %357, %356 : vector<1x32xf32>
    %359 = arith.divf %357, %358 : vector<1x32xf32>
    %360 = arith.mulf %351, %333 : vector<1x32xf32>
    %361 = arith.mulf %345, %353 : vector<1x32xf32>
    %362 = arith.addf %360, %361 : vector<1x32xf32>
    %363 = math.tanh %362 : vector<1x32xf32>
    %364 = arith.mulf %359, %363 : vector<1x32xf32>
    %c0_104 = arith.constant 0 : index
    %c0_105 = arith.constant 0 : index
    %365 = vector.load %arg12[%c0_104, %c0_105] : memref<32x32xf32, #tpu.memory_space<vmem>>, vector<32x32xf32>
    %cst_106 = arith.constant dense<0.000000e+00> : vector<1x32xf32>
    %366 = tpu.matmul %364, %365, %cst_106 {dimension_numbers = #tpu.dot_dimension_numbers<[1], [0], [0], [1], [0, 0, 1, 1], [], []>} : vector<1x32xf32>, vector<32x32xf32>, vector<1x32xf32> -> vector<1x32xf32>
    %c0_107 = arith.constant 0 : index
    %c0_108 = arith.constant 0 : index
    %367 = vector.load %arg13[%c0_107, %c0_108] : memref<1x32xf32, #tpu.memory_space<vmem>>, vector<1x32xf32>
    %368 = arith.addf %366, %367 : vector<1x32xf32>
    %cst_109 = arith.constant 0.000000e+00 : f32
    %369 = vector.broadcast %cst_109 : f32 to vector<1x32xf32>
    %370 = arith.maximumf %368, %369 : vector<1x32xf32>
    %c0_110 = arith.constant 0 : index
    %c0_111 = arith.constant 0 : index
    %371 = vector.load %arg14[%c0_110, %c0_111] : memref<32x4xf32, #tpu.memory_space<vmem>>, vector<32x4xf32>
    %cst_112 = arith.constant dense<0.000000e+00> : vector<1x4xf32>
    %372 = tpu.matmul %370, %371, %cst_112 {dimension_numbers = #tpu.dot_dimension_numbers<[1], [0], [0], [1], [0, 0, 1, 1], [], []>} : vector<1x32xf32>, vector<32x4xf32>, vector<1x4xf32> -> vector<1x4xf32>
    %c0_113 = arith.constant 0 : index
    %c0_114 = arith.constant 0 : index
    %373 = vector.load %arg15[%c0_113, %c0_114] : memref<1x4xf32, #tpu.memory_space<vmem>>, vector<1x4xf32>
    %374 = arith.addf %372, %373 : vector<1x4xf32>
    %c0_115 = arith.constant 0 : index
    %c0_116 = arith.constant 0 : index
    %c0_117 = arith.constant 0 : index
    %375 = vector.load %arg16[%c0_115, %c0_116, %c0_117] : memref<1x1x4xf32, #tpu.memory_space<vmem>>, vector<1x1x4xf32>
    %376 = vector.shape_cast %375 : vector<1x1x4xf32> to vector<1x4xf32>
    %377 = vector.shape_cast %374 : vector<1x4xf32> to vector<1x1x4xf32>
    tpu.vector_store %arg16[%c0_115, %c0_116, %c0_117], %377 {strides = array<i32>} : memref<1x1x4xf32, #tpu.memory_space<vmem>>, vector<1x1x4xf32>,
    return
  }
  func.func @transform_0(%arg0: i32) -> (i32, i32, i32) {
    %c0_i32 = arith.constant 0 : i32
    %c0_i32_0 = arith.constant 0 : i32
    %c0_i32_1 = arith.constant 0 : i32
    return %arg0, %c0_i32, %c0_i32_0 : i32, i32, i32
  }
  func.func @transform_1(%arg0: i32) -> (i32, i32, i32) {
    %c0_i32 = arith.constant 0 : i32
    %c0_i32_0 = arith.constant 0 : i32
    %c0_i32_1 = arith.constant 0 : i32
    return %arg0, %c0_i32, %c0_i32_0 : i32, i32, i32
  }
  func.func @transform_2(%arg0: i32) -> (i32, i32) {
    %c0_i32 = arith.constant 0 : i32
    %c0_i32_0 = arith.constant 0 : i32
    %c0_i32_1 = arith.constant 0 : i32
    return %c0_i32, %c0_i32_0 : i32, i32
  }
  func.func @transform_3(%arg0: i32) -> (i32, i32) {
    %c0_i32 = arith.constant 0 : i32
    %c0_i32_0 = arith.constant 0 : i32
    %c0_i32_1 = arith.constant 0 : i32
    return %c0_i32, %c0_i32_0 : i32, i32
  }
  func.func @transform_4(%arg0: i32) -> (i32, i32, i32) {
    %c0_i32 = arith.constant 0 : i32
    %c0_i32_0 = arith.constant 0 : i32
    %c0_i32_1 = arith.constant 0 : i32
    %c0_i32_2 = arith.constant 0 : i32
    return %c0_i32, %c0_i32_0, %c0_i32_1 : i32, i32, i32
  }
  func.func @transform_5(%arg0: i32) -> (i32, i32, i32) {
    %c0_i32 = arith.constant 0 : i32
    %c0_i32_0 = arith.constant 0 : i32
    %c0_i32_1 = arith.constant 0 : i32
    %c0_i32_2 = arith.constant 0 : i32
    return %c0_i32, %c0_i32_0, %c0_i32_1 : i32, i32, i32
  }
  func.func @transform_6(%arg0: i32) -> (i32, i32) {
    %c0_i32 = arith.constant 0 : i32
    %c0_i32_0 = arith.constant 0 : i32
    %c0_i32_1 = arith.constant 0 : i32
    return %c0_i32, %c0_i32_0 : i32, i32
  }
  func.func @transform_7(%arg0: i32) -> (i32, i32) {
    %c0_i32 = arith.constant 0 : i32
    %c0_i32_0 = arith.constant 0 : i32
    %c0_i32_1 = arith.constant 0 : i32
    return %c0_i32, %c0_i32_0 : i32, i32
  }
  func.func @transform_8(%arg0: i32) -> (i32, i32) {
    %c0_i32 = arith.constant 0 : i32
    %c0_i32_0 = arith.constant 0 : i32
    %c0_i32_1 = arith.constant 0 : i32
    return %c0_i32, %c0_i32_0 : i32, i32
  }
  func.func @transform_9(%arg0: i32) -> (i32, i32) {
    %c0_i32 = arith.constant 0 : i32
    %c0_i32_0 = arith.constant 0 : i32
    %c0_i32_1 = arith.constant 0 : i32
    return %c0_i32, %c0_i32_0 : i32, i32
  }
  func.func @transform_10(%arg0: i32) -> (i32, i32) {
    %c0_i32 = arith.constant 0 : i32
    %c0_i32_0 = arith.constant 0 : i32
    %c0_i32_1 = arith.constant 0 : i32
    return %c0_i32, %c0_i32_0 : i32, i32
  }
  func.func @transform_11(%arg0: i32) -> (i32, i32) {
    %c0_i32 = arith.constant 0 : i32
    %c0_i32_0 = arith.constant 0 : i32
    %c0_i32_1 = arith.constant 0 : i32
    return %c0_i32, %c0_i32_0 : i32, i32
  }
  func.func @transform_12(%arg0: i32) -> (i32, i32) {
    %c0_i32 = arith.constant 0 : i32
    %c0_i32_0 = arith.constant 0 : i32
    %c0_i32_1 = arith.constant 0 : i32
    return %c0_i32, %c0_i32_0 : i32, i32
  }
  func.func @transform_13(%arg0: i32) -> (i32, i32) {
    %c0_i32 = arith.constant 0 : i32
    %c0_i32_0 = arith.constant 0 : i32
    %c0_i32_1 = arith.constant 0 : i32
    return %c0_i32, %c0_i32_0 : i32, i32
  }
  func.func @transform_14(%arg0: i32) -> (i32, i32) {
    %c0_i32 = arith.constant 0 : i32
    %c0_i32_0 = arith.constant 0 : i32
    %c0_i32_1 = arith.constant 0 : i32
    return %c0_i32, %c0_i32_0 : i32, i32
  }
  func.func @transform_15(%arg0: i32) -> (i32, i32, i32) {
    %c0_i32 = arith.constant 0 : i32
    %c0_i32_0 = arith.constant 0 : i32
    %c0_i32_1 = arith.constant 0 : i32
    return %arg0, %c0_i32, %c0_i32_0 : i32, i32, i32
  }
}

</mosaic_0001>

<bundles_post_ra>
// kernel: tpu_custom_call.1
= control target key start
LH: loop header
LB: loop body
LE: loop exit
PB: predicated region body
PF: predicated region fallthrough
CT: control target
= control target key end

     0   :  { %s3040_s0 = inlined_call_operand.vmem [shape: f32[2,16,8], index: 0, kind: input, shape index: {}]   ;;  %s3041_s1 = inlined_call_operand.hbm [shape: bf16[2,16,16], index: 1, kind: input, shape index: {}]   ;;  %s3042_s2 = inlined_call_operand.hbm [shape: f32[8,32], index: 2, kind: input, shape index: {}]   ;;  %s3043_s3 = inlined_call_operand.hbm [shape: f32[9,32], index: 3, kind: input, shape index: {}]   ;;  %s3044_s4 = inlined_call_operand.vmem [shape: f32[2,32,32], index: 4, kind: input, shape index: {}]   ;;  %s3045_s5 = inlined_call_operand.vmem [shape: f32[2,33,32], index: 5, kind: input, shape index: {}]   ;;  %s3046_s6 = inlined_call_operand.vmem [shape: f32[3,32], index: 6, kind: input, shape index: {}]   ;;  %s3047_s7 = inlined_call_operand.hbm [shape: f32[3,32], index: 7, kind: input, shape index: {}]   ;;  %s3048_s8 = inlined_call_operand.vmem [shape: f32[64,128], index: 8, kind: input, shape index: {}]   ;;  %s3049_s9 = inlined_call_operand.vmem [shape: f32[32,128], index: 9, kind: input, shape index: {}]   ;;  %s3050_s10 = inlined_call_operand.vmem [shape: f32[1,128], index: 10, kind: input, shape index: {}]   ;;  %s3051_s11 = inlined_call_operand.hbm [shape: f32[32,32], index: 11, kind: input, shape index: {}]   ;;  %s3052_s12 = inlined_call_operand.vmem [shape: f32[1,32], index: 12, kind: input, shape index: {}]   ;;  %s3053_s13 = inlined_call_operand.vmem [shape: f32[32,4], index: 13, kind: input, shape index: {}]   ;;  %s3054_s14 = inlined_call_operand.vmem [shape: f32[1,4], index: 14, kind: input, shape index: {}]   ;;  %s3055_s15 = inlined_call_operand.hbm [shape: f32[2,1,4], index: 15, kind: output, shape index: {}]  }
   0x1   :  { %3059 = sst [smem:[#allocation20_spill]] %s3042_s2 }
   0x2   :  { %3060 = sst [smem:[#allocation21_spill]] %s3043_s3 }
   0x3   :  { %3061 = sst [smem:[#allocation22_spill]] %s3047_s7 }
   0x4   :  { %3062 = sst [smem:[#allocation23_spill]] %s3051_s11 }
   0x5   :  { %3063 = sst [smem:[#allocation24_spill]] %s3054_s14 }
   0x6   :  { %20 = vsyncpa [#allocation3], 0 }
   0x7   :  { %22 = vsyncpa [#allocation3 + $0x1], 0 }
   0x8   :  { %23 = vsyncpa [#allocation6], 0 }
   0x9   :  { %24 = vsyncpa [#allocation9], 0 }
   0xa   :  { %25 = vsyncpa [#allocation4], 0 }
   0xb   :  { %27 = vsyncpa [#allocation4 + $0x1], 0  ;;  %s2406_s18 = smov 0   ;;  %s2408_s19 = smov 0  }
   0xc   :  { %s2410_s20 = smov 0   ;;  %s2412_s21 = smov 0  }
   0xd LB: > { %3064 = sst [smem:[#allocation16_spill]] %s2299_s18  ;;  %s2427_s22 = sadd.s32 4294967295, %s2311_s21   ;;  %s2311_s21 = sphi %s2412_s21, %s3088_s21   ;;  %s2307_s20 = sphi %s2410_s20, %s3085_s20   ;;  %s2303_s19 = sphi %s2408_s19, %s3087_s19   ;;  %s2299_s18 = sphi %s2406_s18, %s3086_s18  }
   0xe   : > { %3065 = sst [smem:[#allocation17_spill]] %s2307_s20  ;;  %s1835_s23 = sadd.s32 4294967294, %s2311_s21  }
   0xf   : > { %p79_p0 = scmp.ne.s32.totalorder %s2303_s19, %s2299_s18  ;;  %p80_p1 = scmp.eq.s32.totalorder %s2427_s22, 0 }
  0x10   : > { %p376_p2 = scmp.eq.s32.totalorder %s2427_s22, 1  ;;  %p382_p3 = scmp.eq.s32.totalorder %s1835_s23, 1 }
  0x11   : > { %p2436_p4 = por %p80_p1, %p79_p0  ;;  %p1836_p5 = scmp.ge.s32.totalorder %s2311_s21, 1 }
  0x12   : > { %p2441_p6 = por %p382_p3, %p79_p0  ;;  %p389_p7 = scmp.lt.s32.totalorder %s2311_s21, 3 }
  0x13   : > { %s3069_s2 = sld [smem:[#allocation20_spill]]  ;;  %s2313_s30 = smov [#allocation5]  }
  0x14   : > { %s3067_s25 = scalar_select %p2441_p6, 1, 0 }
  0x15   : > { %p2449_p8 = pnand %p1836_p5, %p389_p7  ;;  %s403_s16 = sshll.u32 %s2313_s30, 4  ;;  %s404_s16 = int_to_ptr.vmem [resolvable:$true] %s403_s16 }
  0x16   : > { %3068 = sst [smem:[#allocation18_spill]] %s3067_s25  ;;  %s2314_s14 = smov [#allocation8]  }
  0x17   : > { %p1941_p10 = pneg %p2449_p8  ;;  %s3071_s7 = sld [smem:[#allocation22_spill]] }
  0x18   : > { %s3073_s3 = sld [smem:[#allocation21_spill]]  ;;  %s438_s30 = sshll.u32 %s2314_s14, 4  ;;  %s439_s30 = int_to_ptr.vmem [resolvable:$true] %s438_s30 }
  0x19   : > { %s401_s28 = sshll.u32 %s3069_s2, 4  ;;  %p2461_p11 = pnand %p1941_p10, %p80_p1  ;;  %s402_s28 = int_to_ptr.hbm [resolvable:$true] %s401_s28 }
  0x1a   : > { %s2315_s17 = smov [#allocation7]   ;;  %s3074_s11 = sld [smem:[#allocation23_spill]] }
  0x1b   : > { %1944 = dma.hbm_to_vmem [thread:$0]  (!%p2461_p11), %s402_s28, 128, %s404_s16, [#allocation6]  }
  0x1c   : > { %s414_s23 = sshll.u32 %s2315_s17, 4  ;;  %s2316_s28 = smov 128   ;;  %s415_s23 = int_to_ptr.vmem [resolvable:$true] %s414_s23 }
  0x1d   : > { %s436_s25 = sshll.u32 %s3071_s7, 4  ;;  %s2317_s16 = smov 8   ;;  %s437_s25 = int_to_ptr.hbm [resolvable:$true] %s436_s25 }
  0x1e   : > { %s412_s18 = sshll.u32 %s3073_s3, 4  ;;  %s2480_s17 = sadd.s32 1, %s2311_s21   ;;  %s413_s18 = int_to_ptr.hbm [resolvable:$true] %s412_s18 }
  0x1f   : > { %1950 = dma.hbm_to_vmem [thread:$0]  (!%p2461_p11), %s437_s25, 64, %s439_s30, [#allocation9]  }
  0x20   : > { %s456_s14 = sshll.u32 %s3074_s11, 4  ;;  %s2318_s25 = smov [#allocation10]   ;;  %s457_s14 = int_to_ptr.hbm [resolvable:$true] %s456_s14 }
  0x21   : > { %1947 = dma.hbm_to_vmem [thread:$0]  (!%p2461_p11), %s413_s18, 256, %s415_s23, [#allocation6], %s2316_s28, %s2316_s28, %s2317_s16  }
  0x22   : > { %s458_s30 = sshll.u32 %s2318_s25, 4  ;;  %s66_s2 = sadd.s32 1, %s2307_s20  ;;  %s459_s30 = int_to_ptr.vmem [resolvable:$true] %s458_s30 }
  0x23   : > { %1953 = dma.hbm_to_vmem [thread:$0]  (!%p2461_p11), %s457_s14, 512, %s459_s30, [#allocation9], %s2316_s28, %s2316_s28, %s2317_s16  }
  0x24   : > { %s63_s27 = ssub.s32 %s2311_s21, %s2480_s17  ;;  %p73_p12 = scmp.ne.s32.totalorder %s2307_s20, %s2303_s19 }
  0x25   : > { %p64_p13 = scmp.eq.s32.totalorder %s63_s27, 0  ;;  %p74_p0 = scmp.eq.s32.totalorder %s2311_s21, 0 }
  0x26   : > { %p2490_p3 = por %p376_p2, %p73_p12  ;;  %p1966_p5 = scmp.lt.s32.totalorder %s2311_s21, 2 }
  0x27   : > { %s2496_s18 = scalar_select %p64_p13, %s2307_s20, %s66_s2  }
  0x28   : > { %p75_p7 = por %p74_p0, %p73_p12  ;;  %s489_s23 = sand.u32 1, %s2307_s20  }
  0x29   : > { %3076 = sst [smem:[#allocation19_spill]] %s2496_s18  ;;  %s1842_s26 = sshll.u32 %s489_s23, 3 }
  0x2a   : > { %s1915_s14 = sshll.u32 %s2311_s21, 3  ;;  %s493_s30 = scalar_lea.vmem [#allocation2], %s1842_s26 }
  0x2b   : > { %s498_s25 = scalar_lea.hbm %s3041_s1, %s1915_s14  ;;  %s501_s7 = sshll.u32 %s493_s30, 4  ;;  %s502_s7 = int_to_ptr.vmem [resolvable:$true] %s501_s7 }
  0x2c   : > { %s499_s27 = sshll.u32 %s498_s25, 4  ;;  %p2503_p2 = pnand %p1966_p5, %p75_p7  ;;  %s500_s27 = int_to_ptr.hbm [resolvable:$true] %s499_s27 }
  0x2d   : > { %s490_s2 = scalar_lea.sflag [#allocation3], %s489_s23  ;;  %s2207_s18 = sshra.s32 %s500_s27, 4  ;;  %s2208_s18 = int_to_ptr.hbm [resolvable:$true] %s2207_s18 }
  0x2e   : > { %s2209_s20 = scalar_lea.hbm %s2208_s18, 8  ;;  %p2211_p11 = pneg %p2503_p2 }
  0x2f   : > { %p2210_p10 = scmp.ne.s32.totalorder %s2208_s18, %s2209_s20  ;;  %s2214_s28 = scalar_lea.hbm %s3041_s1, 16 }
  0x30   : > { %p2215_p0 = scmp.lt.s32.totalorder %s2208_s18, %s3041_s1  ;;  %p2216_p5 = scmp.lt.s32.totalorder %s2214_s28, %s2209_s20 }
  0x31   : > { %p2212_p12 = pnand %p2211_p11, %p2210_p10 }
  0x32   : > { %p2217_p7 = por %p2216_p5, %p2215_p0 }
  0x33   : > { %p2213_p13 = pneg %p2212_p12 }
  0x35   : > { %p2218_p9 = pnand %p2217_p7, %p2213_p13 }
  0x37   : > { %2221 = shalt.err (!%p2218_p9)
}
  0x38   : > { %s2319_s23 = smov 64   ;;  %s2320_s30 = smov 4  }
  0x39   : > { %1957 = dma.hbm_to_vmem [thread:$0]  (!%p2503_p2), %s500_s27, 128, %s502_s7, %s490_s2, %s2319_s23, %s2319_s23, %s2320_s30  }
  0x3a   : > { %513 = sbr.rel (%p2449_p8) target bundleno = 3490 (0xda2), region = 80  ;;  %s2520_s14 = sand.u32 (!%p2449_p8), 1, %s2303_s19  }
  0x3b   : > { %s1846_s26 = sshll.u32 (!%p2449_p8), %s2520_s14, 3  ;;  %s516_s18 = scalar_lea.sflag (!%p2449_p8), [#allocation3], %s2520_s14 }
  0x3c   : > { %s519_s20 = scalar_lea.vmem (!%p2449_p8), [#allocation2], %s1846_s26 }
  0x3f   : > { %2282 = dma.done.wait (%p2436_p4), %s516_s18, 128  }
  0x40   : > { %2284 = vsyncadd (%p2436_p4), %s516_s18, 4294967168 }
  0x41   : > { %2286 = dma.done.wait (%p80_p1), [#allocation6], 384  }
  0x42   : > { %2288 = vsyncadd (%p80_p1), [#allocation6], 4294966912 }
  0x43   : > { %2290 = dma.done.wait (%p80_p1), [#allocation9], 576  }
  0x44   : > { %2292 = vsyncadd (%p80_p1), [#allocation9], 4294966720  ;;  %p591_p8 = scmp.lt.s32.totalorder %s2427_s22, 1  ;;  %vm607_vm0 = vcmask 64512   ;;  %v1918_v2 = vld [vmem:[%s519_s20] sm:$0xff]   ;;  %vm610_vm1 = vcmask 130048   ;;  %v737_v39 = vlaneseq  ;;  %s1715_s29 = scalar_lea.hbm %s3055_s15, %s2427_s22 }
  0x45   : > { %v2543_v5 = vunpack.c.l.bf16 %v1918_v2  ;;  %v2547_v6 = vunpack.c.h.bf16 %v1918_v2  ;;  %v2321_v7 = vmov 8   ;;  %v604_v8 = vld [vmem:[#allocation5] sm:$0xff]  ;;  %v606_v9 = vld [vmem:[#allocation7 + $0x8] sm:$0x1]  ;;  %vm663_vm2 = vcmask 1040384   ;;  %v605_v16 = vld [vmem:[#allocation7] sm:$0xff] }
  0x46   : > { %s592_s7 = scalar_select %p591_p8, %s2427_s22, 1  ;;  %2017 = vset.pattern.permute.xlu0 %v2321_v7  ;;  %711 = vmatpush.msra.mxu2 %v604_v8  ;;  %vm656_vm3 = vcmask 72704   ;;  %v2557_v21 = vld [vmem:[%s3046_s6] sm:$0x7]  ;;  %v2560_v25 = vld [vmem:[#allocation8] sm:$0x7] }
  0x47   : > { %1855 = vmatpush.msk.msra.mxu1 %vm663_vm2, %v606_v9  ;;  %v719_v23 = vperm.slane %v2557_v21, 0  ;;  %v724_v28 = vperm.slane %v2560_v25, 0  ;;  %vm727_vm4 = vcmask 261120   ;;  %v2575_v40 = vshrl.u32 %v737_v39, 7  ;;  %v872_v9 = vld [vmem:[%s3044_s4 + $0x10] sm:$0xff]  ;;  %s2324_s20 = smov 32  }
  0x48   : > { %s1916_s11 = sshll.u32 %s592_s7, 4  ;;  %v2577_v41 = vand.u32 127, %v737_v39  ;;  %v2322_v44 = vmov 0.0   ;;  %s3080_s2 = sld [smem:[#allocation24_spill]] }
  0x49   : > { %s595_s27 = scalar_lea.vmem %s3040_s0, %s1916_s11  ;;  %682 = vmatpush.msra.mxu1 %v605_v16  ;;  %v2580_v42 = vadd.s32 8, %v2575_v40  ;;  %s2325_s11 = smov 64  }
  0x4a   : > { %v601_v0 = vld [vmem:[%s595_s27 + $0x8] sm:$0xff]  ;;  %v600_v1 = vld [vmem:[%s595_s27] sm:$0xff]  ;;  %vm742_vm5 = vcmp.eq.s32.totalorder %v2575_v40, %v2577_v41  ;;  %vm763_vm11 = vcmp.lt.s32.totalorder %v2577_v41, %v2575_v40  ;;  %s590_s28 = scalar_lea.vmem [#allocation11], %s2520_s14  ;;  %s1719_s25 = sshll.u32 %s1715_s29, 4  ;;  %s1720_s25 = int_to_ptr.hbm [resolvable:$true] %s1719_s25 }
  0x4b   : > { %v609_v3 = vsel %vm607_vm0, %v601_v0, 1.0  ;;  %v608_v4 = vsel %vm607_vm0, %v600_v1, 1.0  ;;  %1858 = vmatmul.msk.f32.vlgmr.msra.gmra.mxu2 %vm607_vm0, %v600_v1  ;;  %vm743_vm6 = vcmp.eq.s32.totalorder %v2580_v42, %v2577_v41  ;;  %v2587_v45 = vsel %vm742_vm5, 1.0, %v2322_v44  ;;  %s1717_s16 = sshll.u32 %s590_s28, 4  ;;  %s1707_s23 = scalar_lea.sflag [#allocation4], %s2520_s14  ;;  %s1718_s16 = int_to_ptr.vmem [resolvable:$true] %s1717_s16 }
  0x4c   : > { %631 = vmatpush.msra.mxu0 %v609_v3  ;;  %v2590_v46 = vsel %vm743_vm6, 1.0, %v2322_v44  ;;  %vm764_vm7 = vcmp.lt.s32.totalorder %v2577_v41, %v2580_v42  ;;  %s2257_s18 = scalar_lea.hbm %s3055_s15, 2 }
  0x4e   : > { %632 = vmatpush.msra.mxu0 %v608_v4  ;;  %v873_v4 = vld [vmem:[%s3044_s4 + $0x18] sm:$0xff] }
  0x4f   : > { %1853 = vmatmul.msk.f32.vlgmr.msra.gmra.mxu0 %vm610_vm1, %v2543_v5 }
  0x50   : > { %973 = vmatpush.msrb.mxu0 %v873_v4 }
  0x52   : > { %974 = vmatpush.msrb.mxu0 %v872_v9 }
  0x53   : > { %1859 = vmatmul.msk.f32.gmra.mxu2 %vm607_vm0, %v601_v0 }
  0x57   : > { %1854 = vmatmul.msk.f32.gmra.mxu0 %vm610_vm1, %v2547_v6 }
  0xcc   : > { %v634_v10 = vpop.f32.mrf.mxu0 }
  0xcd   : > { %v640_v11 = vmax.f32 %v634_v10, 1.0 }
  0xce   : > { %v713_v22 = vpop.f32.mrf.mxu2 }
  0xcf   : > { %2021 = vrcp.f32 %v640_v11  ;;  %v871_v11 = vld [vmem:[%s3044_s4 + $0x8] sm:$0xff] }
  0xd0   : > { %975 = vmatpush.msrb.mxu0 %v871_v11 }
  0xd4   : > { %v637_v12 = vpop.f32.mrf.mxu0 }
  0xd5   : > { %v2022_v13 = vpop.eup %2021  ;;  %v641_v14 = vmax.f32 %v637_v12, 1.0 }
  0xd6   : > { %646 = vperm.xlu0 %2017, %v2022_v13   ;;  %v716_v30 = vpop.f32.mrf.mxu2 }
  0xd7   : > { %2023 = vrcp.f32 %v641_v14 }
  0xdd   : > { %v2024_v15 = vpop.eup %2023 }
  0xde   : > { %651 = vperm.xlu0 %2017, %v2024_v15  }
 0x148   : > { %v647_v17 = vpop.permute.xlu0 %646 }
 0x149   : > { %v654_v18 = vmul.f32 %v647_v17, %v634_v10 }
 0x14b   : > { %1856 = vmatmul.msk.f32.vlgmr.msra.gmra.mxu1 %vm656_vm3, %v654_v18 }
 0x150   : > { %v652_v19 = vpop.permute.xlu0 %651 }
 0x151   : > { %v655_v20 = vmul.f32 %v652_v19, %v637_v12  ;;  %v870_v12 = vld [vmem:[%s3044_s4] sm:$0xff] }
 0x152   : > { %976 = vmatpush.msrb.mxu0 %v870_v12 }
 0x153   : > { %1857 = vmatmul.msk.f32.gmra.mxu1 %vm656_vm3, %v655_v20 }
 0x1c8   : > { %v684_v24 = vpop.f32.mrf.mxu1 }
 0x1c9   : > { %v714_v26 = vadd.f32 %v713_v22, %v684_v24 }
 0x1cb   : > { %v2562_v27 = vadd.f32 %v719_v23, %v714_v26 }
 0x1cd   : > { %v722_v29 = vmax.f32 %v2562_v27, 0.0 }
 0x1cf   : > { %v725_v31 = vmul.f32 %v724_v28, %v722_v29 }
 0x1d0   : > { %v687_v32 = vpop.f32.mrf.mxu1 }
 0x1d1   : > { %v717_v33 = vadd.f32 %v716_v30, %v687_v32  ;;  %v728_v34 = vsel %vm727_vm4, %v725_v31, 0.0 }
 0x1d2   : > { %729 = vadd.xlane.f32.xlu1 %v728_v34 }
 0x1d3   : > { %v2569_v35 = vadd.f32 %v719_v23, %v717_v33 }
 0x1d5   : > { %v723_v36 = vmax.f32 %v2569_v35, 0.0 }
 0x1d7   : > { %v726_v37 = vmul.f32 %v724_v28, %v723_v36 }
 0x1d9   : > { %v731_v38 = vsel %vm727_vm4, %v726_v37, 0.0 }
 0x1da   : > { %732 = vadd.xlane.f32.xlu1 %v731_v38 }
 0x245   : > { %v730_v43 = vpop.xlane.xlu1 %729 }
 0x246   : > { %v748_v47 = vmul.f32 %v2587_v45, %v730_v43  ;;  %v1866_v0 = vmul.f32 -1.442695, %v730_v43 }
 0x248   : > { %v750_v50 = vsel %vm610_vm1, %v748_v47, 0.0 }
 0x24d   : > { %v733_v48 = vpop.xlane.xlu1 %732 }
 0x24e   : > { %v749_v49 = vmul.f32 %v2590_v46, %v733_v48  ;;  %v1867_v63 = vmul.f32 -1.442695, %v733_v48 }
 0x250   : > { %v751_v51 = vsel %vm610_vm1, %v749_v49, 0.0  ;;  %2025 = vpow2.f32 %v1867_v63  ;;  %v875_v63 = vld [vmem:[%s3045_s5 + $0x8] sm:$0xff] }
 0x251   : > { %v752_v52 = vadd.f32 %v751_v51, %v750_v50  ;;  %2027 = vpow2.f32 %v1866_v0 }
 0x253   : > { %v753_v53 = vrot.slane %v752_v52, 4 }
 0x255   : > { %v754_v54 = vadd.f32 %v753_v53, %v752_v52 }
 0x256   : > { %v2026_v1 = vpop.eup %2025 }
 0x257   : > { %v755_v55 = vrot.slane %v754_v54, 2  ;;  %v794_v2 = vadd.f32 1.0, %v2026_v1  ;;  %v2028_v3 = vpop.eup %2027 }
 0x258   : > { %v793_v7 = vadd.f32 1.0, %v2028_v3 }
 0x259   : > { %v756_v56 = vadd.f32 %v755_v55, %v754_v54  ;;  %2029 = vrcp.f32 %v794_v2  ;;  %v821_v19 = vand.u32 2147483648, %v794_v2  ;;  %vm815_vm5 = vweird.f32 %v794_v2 }
 0x25a   : > { %2031 = vrcp.f32 %v793_v7  ;;  %v819_v20 = vand.u32 2147483647, %v794_v2  ;;  %v806_v31 = vand.u32 2147483648, %v793_v7  ;;  %v804_v33 = vand.u32 2147483647, %v793_v7 }
 0x25b   : > { %v757_v57 = vrot.slane %v756_v56, 1  ;;  %v822_v24 = vor.u32 1.1754944e-38, %v821_v19  ;;  %v991_v19 = vperm.slane %v2560_v25, 1 }
 0x25c   : > { %v807_v39 = vor.u32 1.1754944e-38, %v806_v31 }
 0x25d   : > { %v758_v58 = vadd.f32 %v757_v57, %v756_v56 }
 0x25f   : > { %vm760_vm8 = vcmp.gt.f32.partialorder %v758_v58, %v733_v48  ;;  %vm762_vm9 = vcmp.eq.f32.partialorder %v758_v58, %v733_v48  ;;  %vm761_vm10 = vcmp.eq.f32.partialorder %v758_v58, %v730_v43  ;;  %vm759_vm14 = vcmp.gt.f32.partialorder %v758_v58, %v730_v43  ;;  %v2030_v8 = vpop.eup %2029 }
 0x260   : > { %vm766_vm12 = vmand %vm762_vm9, %vm764_vm7  ;;  %v811_v10 = vmul.f32 %v2030_v8, %v794_v2  ;;  %v2032_v14 = vpop.eup %2031  ;;  %vm816_vm3 = vweird.f32 %v2030_v8 }
 0x261   : > { %vm768_vm13 = vmor %vm760_vm8, %vm766_vm12  ;;  %v796_v15 = vmul.f32 %v2032_v14, %v793_v7  ;;  %vm820_vm8 = vcmp.eq.f32.partialorder %v819_v20, 8.507059e+37  ;;  %vm801_vm9 = vweird.f32 %v2032_v14  ;;  %vm800_vm12 = vweird.f32 %v793_v7 }
 0x262   : > { %v1863_v59 = vsel %vm768_vm13, 1.0, %v2322_v44  ;;  %vm765_vm15 = vmand %vm761_vm10, %vm763_vm11  ;;  %v812_v13 = vsub.f32 1.0, %v811_v10 }
 0x263   : > { %v776_v60 = vsel %vm610_vm1, %v1863_v59, 0.0  ;;  %vm767_vm0 = vmor %vm759_vm14, %vm765_vm15  ;;  %v797_v17 = vsub.f32 1.0, %v796_v15  ;;  %vm805_vm14 = vcmp.eq.f32.partialorder %v804_v33, 8.507059e+37  ;;  %v2323_v59 = vmov 32  }
 0x264   : > { %777 = vadd.xlane.f32.xlu2 %v776_v60  ;;  %v1862_v61 = vsel %vm767_vm0, 1.0, %v2322_v44  ;;  %v813_v16 = vmul.f32 %v2030_v8, %v812_v13  ;;  %vm817_vm6 = vmor %vm815_vm5, %vm816_vm3  ;;  %2018 = vset.pattern.permute.xlu0 %v2323_v59  ;;  %v878_v60 = vld [vmem:[%s3045_s5 + $0x20] sm:$0x1]  ;;  %vm922_vm5 = vcmask 269312  }
 0x265   : > { %v773_v62 = vsel %vm610_vm1, %v1862_v61, 0.0  ;;  %v798_v23 = vmul.f32 %v2032_v14, %v797_v17  ;;  %vm802_vm13 = vmor %vm800_vm12, %vm801_vm9  ;;  %2019 = vset.pattern.permute.xlu1 %v2323_v59  ;;  %2020 = vset.pattern.permute.xlu2 %v2323_v59  ;;  %v877_v61 = vld [vmem:[%s3045_s5 + $0x18] sm:$0xff] }
 0x266   : > { %v814_v18 = vadd.f32 %v2030_v8, %v813_v16  ;;  %1870 = vmatpush.msk.msrb.mxu2 %vm663_vm2, %v878_v60 }
 0x267   : > { %v799_v28 = vadd.f32 %v2032_v14, %v798_v23 }
 0x268   : > { %v818_v22 = vsel %vm817_vm6, %v2030_v8, %v814_v18  ;;  %944 = vmatpush.msrb.mxu2 %v877_v61  ;;  %v874_v8 = vld [vmem:[%s3045_s5] sm:$0xff] }
 0x269   : > { %v823_v26 = vsel %vm820_vm8, %v822_v24, %v818_v22  ;;  %v803_v38 = vsel %vm802_vm13, %v2032_v14, %v799_v28  ;;  %v984_v14 = vperm.slane %v2557_v21, 1 }
 0x26a   : > { %v826_v32 = vmul.f32 %v823_v26, %v723_v36  ;;  %v808_v47 = vsel %vm805_vm14, %v807_v39, %v803_v38 }
 0x26b   : > { %v825_v36 = vmul.f32 %v808_v47, %v722_v29 }
 0x26c   : > { %774 = vadd.xlane.f32.xlu2 %v773_v62  ;;  %v876_v62 = vld [vmem:[%s3045_s5 + $0x10] sm:$0xff] }
 0x26d   : > { %945 = vmatpush.msrb.mxu2 %v876_v62 }
 0x26f   : > { %946 = vmatpush.msrb.mxu2 %v875_v63 }
 0x271   : > { %947 = vmatpush.msrb.mxu2 %v874_v8 }
 0x2d7   : > { %v778_v30 = vpop.xlane.xlu2 %777 }
 0x2d8   : > { %vm780_vm10 = vcmp.lt.f32.partialorder %v778_v30, 8.0 }
 0x2d9   : > { %v2625_v34 = vsel %vm780_vm10, 1.0, %v2322_v44 }
 0x2da   : > { %v828_v37 = vmul.f32 %v2625_v34, %v826_v32  ;;  %vm849_vm15 = vcmp.gt.f32.partialorder %v2625_v34, 0.0 }
 0x2dc   : > { %v880_v43 = vmul.f32 %v2625_v34, %v828_v37  ;;  %v855_v51 = vsel %vm849_vm15, %v828_v37, -3.4028235e+38  ;;  %v838_v27 = vsel %vm727_vm4, %v828_v37, 0.0 }
 0x2dd   : > { %v857_v55 = vsel %vm727_vm4, %v855_v51, -inf }
 0x2de   : > { %v882_v48 = vsel %vm727_vm4, %v880_v43, %v2625_v34 }
 0x2df   : > { %897 = vmatpush.msra.mxu3 %v882_v48  ;;  %v775_v35 = vpop.xlane.xlu2 %774 }
 0x2e0   : > { %vm779_vm0 = vcmp.lt.f32.partialorder %v775_v35, 8.0 }
 0x2e1   : > { %v2635_v49 = vsel %vm779_vm0, 1.0, %v2322_v44 }
 0x2e2   : > { %v827_v50 = vmul.f32 %v2635_v49, %v825_v36  ;;  %vm848_vm3 = vcmp.gt.f32.partialorder %v2635_v49, 0.0 }
 0x2e4   : > { %1873 = vmatmul.msk.f32.vlgmr.msrb.gmra.mxu0 %vm727_vm4, %v827_v50  ;;  %v879_v52 = vmul.f32 %v2635_v49, %v827_v50  ;;  %v854_v53 = vsel %vm848_vm3, %v827_v50, -3.4028235e+38  ;;  %v837_v29 = vsel %vm727_vm4, %v827_v50, 0.0 }
 0x2e5   : > { %v856_v54 = vsel %vm727_vm4, %v854_v53, -inf  ;;  %v2649_v56 = vadd.f32 %v838_v27, %v837_v29 }
 0x2e6   : > { %v881_v57 = vsel %vm727_vm4, %v879_v52, %v2635_v49  ;;  %v2653_v58 = vmax.f32 %v856_v54, %v857_v55 }
 0x2e7   : > { %898 = vmatpush.msra.mxu3 %v881_v57  ;;  %v1884_v57 = vld [vmem:[%s3044_s4 + $0x38] sm:$0xff] }
 0x2e8   : > { %1868 = vmatmul.msk.f32.vlgmr.msra.gmra.mxu3 %vm610_vm1, %v2543_v5  ;;  %1226 = vmatpush.msra.mxu2 %v1884_v57  ;;  %v859_v63 = vrot.slane %v2653_v58, 4 }
 0x2ec   : > { %1874 = vmatmul.msk.f32.gmra.mxu0 %vm727_vm4, %v828_v37 }
 0x2f0   : > { %1869 = vmatmul.msk.f32.gmra.mxu3 %vm610_vm1, %v2547_v6 }
 0x361   : > { %v978_v13 = vpop.f32.mrf.mxu0 }
 0x369   : > { %v981_v22 = vpop.f32.mrf.mxu0 }
 0x36b   : > { %v900_v0 = vpop.f32.mrf.mxu3 }
 0x36c   : > { %v906_v1 = vmax.f32 %v900_v0, 1.0 }
 0x36e   : > { %2033 = vrcp.f32 %v906_v1 }
 0x373   : > { %v903_v2 = vpop.f32.mrf.mxu3 }
 0x374   : > { %v2034_v3 = vpop.eup %2033  ;;  %v907_v4 = vmax.f32 %v903_v2, 1.0 }
 0x375   : > { %912 = vperm.xlu0 %2018, %v2034_v3  }
 0x376   : > { %2035 = vrcp.f32 %v907_v4 }
 0x37c   : > { %v2036_v7 = vpop.eup %2035 }
 0x37d   : > { %917 = vperm.xlu1 %2019, %v2036_v7  }
 0x3e7   : > { %v913_v9 = vpop.permute.xlu0 %912 }
 0x3e8   : > { %v920_v10 = vmul.f32 %v913_v9, %v900_v0  ;;  %v860_v0 = vmax.f32 %v2653_v58, %v859_v63  ;;  %v1883_v58 = vld [vmem:[%s3044_s4 + $0x30] sm:$0xff] }
 0x3e9   : > { %1227 = vmatpush.msra.mxu2 %v1883_v58 }
 0x3ea   : > { %1871 = vmatmul.msk.f32.vlgmr.msrb.gmra.mxu2 %vm922_vm5, %v920_v10  ;;  %v861_v1 = vrot.slane %v860_v0, 2 }
 0x3ef   : > { %v918_v11 = vpop.permute.xlu1 %917 }
 0x3f0   : > { %v921_v12 = vmul.f32 %v918_v11, %v903_v2  ;;  %v862_v2 = vmax.f32 %v860_v0, %v861_v1 }
 0x3f2   : > { %1872 = vmatmul.msk.f32.gmra.mxu2 %vm922_vm5, %v921_v12  ;;  %v863_v3 = vrot.slane %v862_v2, 1 }
 0x3f4   : > { %v864_v4 = vmax.f32 %v862_v2, %v863_v3 }
 0x46d   : > { %v949_v15 = vpop.f32.mrf.mxu2 }
 0x46e   : > { %v979_v16 = vadd.f32 %v978_v13, %v949_v15  ;;  %v1882_v13 = vld [vmem:[%s3044_s4 + $0x28] sm:$0xff] }
 0x46f   : > { %1228 = vmatpush.msra.mxu2 %v1882_v13 }
 0x470   : > { %v985_v17 = vadd.f32 %v984_v14, %v979_v16 }
 0x472   : > { %v987_v18 = vmax.f32 %v985_v17, 0.0 }
 0x474   : > { %v2681_v20 = vmul.f32 %v2635_v49, %v987_v18 }
 0x475   : > { %v952_v23 = vpop.f32.mrf.mxu2 }
 0x476   : > { %v982_v24 = vadd.f32 %v981_v22, %v952_v23  ;;  %v992_v26 = vmul.f32 %v991_v19, %v2681_v20  ;;  %v829_v22 = vadd.f32 %v2625_v34, %v2635_v49 }
 0x478   : > { %v986_v28 = vadd.f32 %v984_v14, %v982_v24  ;;  %v994_v30 = vsel %vm727_vm4, %v992_v26, 0.0  ;;  %v1881_v14 = vld [vmem:[%s3044_s4 + $0x20] sm:$0xff]  ;;  %v2738_v24 = vld [vmem:[%s3048_s8 + $0x30] sm:$0xff] }
 0x479   : > { %995 = vadd.xlane.f32.xlu2 %v994_v30  ;;  %1229 = vmatpush.msra.mxu2 %v1881_v14  ;;  %v830_v30 = vrot.slane %v829_v22, 4 }
 0x47a   : > { %v988_v31 = vmax.f32 %v986_v28, 0.0  ;;  %v2744_v28 = vld [vmem:[%s3048_s8 + $0x28] sm:$0xff] }
 0x47c   : > { %v2686_v32 = vmul.f32 %v2625_v34, %v988_v31 }
 0x47e   : > { %v993_v33 = vmul.f32 %v991_v19, %v2686_v32  ;;  %v2730_v19 = vld [vmem:[%s3048_s8 + $0x38] sm:$0xff] }
 0x47f   : > { %1509 = vmatpush.msrb.mxu2 %v2730_v19 }
 0x480   : > { %v997_v37 = vsel %vm727_vm4, %v993_v33, 0.0  ;;  %v2750_v33 = vld [vmem:[%s3048_s8 + $0x20] sm:$0xff] }
 0x481   : > { %998 = vadd.xlane.f32.xlu2 %v997_v37  ;;  %1510 = vmatpush.msrb.mxu2 %v2738_v24  ;;  %v2755_v37 = vld [vmem:[%s3049_s9 + $0x18] sm:$0xff] }
 0x482   : > { %1403 = vmatpush.msra.mxu0 %v2755_v37 }
 0x483   : > { %1511 = vmatpush.msrb.mxu2 %v2744_v28 }
 0x485   : > { %1512 = vmatpush.msrb.mxu2 %v2750_v33 }
 0x4ec   : > { %v996_v38 = vpop.xlane.xlu2 %995 }
 0x4ed   : > { %v1000_v39 = vsel %vm848_vm3, %v996_v38, -3.4028235e+38  ;;  %v1879_v8 = vmul.f32 -1.442695, %v996_v38  ;;  %v2761_v38 = vld [vmem:[%s3049_s9 + $0x10] sm:$0xff] }
 0x4ee   : > { %v1002_v47 = vmul.f32 %v2587_v45, %v1000_v39  ;;  %1404 = vmatpush.msra.mxu0 %v2761_v38 }
 0x4f0   : > { %v1004_v36 = vsel %vm610_vm1, %v1002_v47, 0.0  ;;  %v2773_v47 = vld [vmem:[%s3049_s9 + $0x8] sm:$0xff] }
 0x4f1   : > { %1405 = vmatpush.msra.mxu0 %v2773_v47 }
 0x4f4   : > { %v999_v43 = vpop.xlane.xlu2 %998 }
 0x4f5   : > { %v1001_v48 = vsel %vm849_vm15, %v999_v43, -3.4028235e+38  ;;  %v1880_v7 = vmul.f32 -1.442695, %v999_v43  ;;  %v2767_v43 = vld [vmem:[%s3048_s8 + $0x18] sm:$0xff] }
 0x4f6   : > { %v1003_v35 = vmul.f32 %v2590_v46, %v1001_v48  ;;  %1513 = vmatpush.msrb.mxu2 %v2767_v43 }
 0x4f7   : > { %2037 = vpow2.f32 %v1880_v7 }
 0x4f8   : > { %v1005_v50 = vsel %vm610_vm1, %v1003_v35, 0.0  ;;  %2039 = vpow2.f32 %v1879_v8 }
 0x4f9   : > { %v1006_v51 = vadd.f32 %v1005_v50, %v1004_v36  ;;  %v2779_v36 = vld [vmem:[%s3048_s8 + $0x10] sm:$0xff] }
 0x4fa   : > { %1514 = vmatpush.msrb.mxu2 %v2779_v36 }
 0x4fb   : > { %v1007_v52 = vrot.slane %v1006_v51, 4 }
 0x4fd   : > { %v1008_v53 = vadd.f32 %v1007_v52, %v1006_v51  ;;  %v2038_v9 = vpop.eup %2037  ;;  %v2785_v51 = vld [vmem:[%s3049_s9] sm:$0xff] }
 0x4fe   : > { %v2040_v10 = vpop.eup %2039  ;;  %v1046_v11 = vadd.f32 1.0, %v2038_v9  ;;  %1406 = vmatpush.msra.mxu0 %v2785_v51  ;;  %v840_v9 = vrot.slane %v2649_v56, 4 }
 0x4ff   : > { %v1009_v27 = vrot.slane %v1008_v53, 2  ;;  %v2714_v12 = vadd.f32 1.0, %v2040_v10  ;;  %1407 = vmatmul.f32.vlgmr.msra.gmra.mxu0 %v2322_v44 }
 0x500   : > { %2041 = vrcp.f32 %v1046_v11  ;;  %v1073_v50 = vand.u32 2147483648, %v1046_v11  ;;  %1576 = vmatpush.msrb.mxu0 %v2755_v37  ;;  %v841_v13 = vadd.f32 %v840_v9, %v2649_v56 }
 0x501   : > { %v1010_v29 = vadd.f32 %v1009_v27, %v1008_v53  ;;  %2043 = vrcp.f32 %v2714_v12  ;;  %v1071_v53 = vand.u32 2147483647, %v1046_v11  ;;  %v2791_v27 = vld [vmem:[%s3048_s8 + $0x8] sm:$0xff]  ;;  %v1056_v57 = vand.u32 2147483647, %v2714_v12 }
 0x502   : > { %1515 = vmatpush.msrb.mxu2 %v2791_v27  ;;  %1577 = vmatpush.msrb.mxu0 %v2761_v38 }
 0x503   : > { %v1011_v54 = vrot.slane %v1010_v29, 1 }
 0x504   : > { %1578 = vmatpush.msrb.mxu0 %v2773_v47 }
 0x505   : > { %v1012_v55 = vadd.f32 %v1011_v54, %v1010_v29  ;;  %v1058_v29 = vand.u32 2147483648, %v2714_v12 }
 0x506   : > { %v2042_v15 = vpop.eup %2041  ;;  %1579 = vmatpush.msrb.mxu0 %v2785_v51 }
 0x507   : > { %vm1016_vm6 = vcmp.eq.f32.partialorder %v1012_v55, %v1001_v48  ;;  %vm1014_vm8 = vcmp.gt.f32.partialorder %v1012_v55, %v1001_v48  ;;  %vm1015_vm9 = vcmp.eq.f32.partialorder %v1012_v55, %v1000_v39  ;;  %vm1013_vm12 = vcmp.gt.f32.partialorder %v1012_v55, %v1000_v39  ;;  %v2044_v16 = vpop.eup %2043 }
 0x508   : > { %vm1018_vm10 = vmand %vm1016_vm6, %vm764_vm7  ;;  %v1063_v17 = vmul.f32 %v2042_v15, %v1046_v11  ;;  %v1048_v18 = vmul.f32 %v2044_v16, %v2714_v12  ;;  %v831_v48 = vadd.f32 %v830_v30, %v829_v22  ;;  %vm1068_vm6 = vweird.f32 %v2042_v15 }
 0x509   : > { %vm1020_vm13 = vmor %vm1014_vm8, %vm1018_vm10  ;;  %vm1053_vm8 = vweird.f32 %v2044_v16  ;;  %v1059_v63 = vor.u32 1.1754944e-38, %v1058_v29 }
 0x50a   : > { %v1876_v59 = vsel %vm1020_vm13, 1.0, %v2322_v44  ;;  %vm1017_vm14 = vmand %vm1015_vm9, %vm763_vm11  ;;  %v1064_v23 = vsub.f32 1.0, %v1063_v17  ;;  %v1049_v26 = vsub.f32 1.0, %v1048_v18  ;;  %vm1067_vm9 = vweird.f32 %v1046_v11 }
 0x50b   : > { %v1028_v60 = vsel %vm610_vm1, %v1876_v59, 0.0  ;;  %vm1019_vm0 = vmor %vm1013_vm12, %vm1017_vm14  ;;  %v832_v55 = vrot.slane %v831_v48, 2  ;;  %vm1052_vm12 = vweird.f32 %v2714_v12  ;;  %vm1072_vm14 = vcmp.eq.f32.partialorder %v1071_v53, 8.507059e+37 }
 0x50c   : > { %1029 = vadd.xlane.f32.xlu0 %v1028_v60  ;;  %v1875_v61 = vsel %vm1019_vm0, 1.0, %v2322_v44  ;;  %v1065_v31 = vmul.f32 %v2042_v15, %v1064_v23  ;;  %v1050_v39 = vmul.f32 %v2044_v16, %v1049_v26  ;;  %vm2794_vm10 = vmor %vm1067_vm9, %vm1068_vm6  ;;  %v2807_v60 = vld [vmem:[%s3048_s8] sm:$0xff]  ;;  %vm1057_vm0 = vcmp.eq.f32.partialorder %v1056_v57, 8.507059e+37 }
 0x50d   : > { %v1025_v62 = vsel %vm610_vm1, %v1875_v61, 0.0  ;;  %vm1054_vm13 = vmor %vm1052_vm12, %vm1053_vm8  ;;  %v1074_v61 = vor.u32 1.1754944e-38, %v1073_v50  ;;  %1516 = vmatpush.msrb.mxu2 %v2807_v60  ;;  %v833_v1 = vadd.f32 %v832_v55, %v831_v48 }
 0x50e   : > { %1026 = vadd.xlane.f32.xlu2 %v1025_v62  ;;  %v1066_v35 = vadd.f32 %v2042_v15, %v1065_v31  ;;  %v1051_v52 = vadd.f32 %v2044_v16, %v1050_v39  ;;  %v842_v31 = vrot.slane %v841_v13, 2 }
 0x50f   : > { %v834_v34 = vrot.slane %v833_v1, 1 }
 0x510   : > { %v1070_v59 = vsel %vm2794_vm10, %v2042_v15, %v1066_v35  ;;  %v1055_v62 = vsel %vm1054_vm13, %v2044_v16, %v1051_v52  ;;  %v843_v48 = vadd.f32 %v842_v31, %v841_v13 }
 0x511   : > { %v1075_v0 = vsel %vm1072_vm14, %v1074_v61, %v1070_v59  ;;  %v1060_v3 = vsel %vm1057_vm0, %v1059_v63, %v1055_v62  ;;  %v835_v49 = vadd.f32 %v834_v34, %v833_v1  ;;  %v2891_v62 = vld [vmem:[%s3050_s10] sm:$0x1] }
 0x512   : > { %v1077_v11 = vmul.f32 %v1060_v3, %v2681_v20  ;;  %v844_v35 = vrot.slane %v843_v48, 1 }
 0x513   : > { %v836_v39 = vmax.f32 %v835_v49, 1.0 }
 0x515   : > { %2045 = vrcp.f32 %v836_v39 }
 0x51b   : > { %v2046_v50 = vpop.eup %2045 }
 0x526   : > { %866 = vrot.lane.b32.xlu2 %v864_v4, %s2324_s20  ;;  %v1078_v4 = vmul.f32 %v1075_v0, %v2686_v32 }
 0x57c   : > { %v1408_v61 = vpop.f32.mrf.mxu0 }
 0x57f   : > { %v1030_v2 = vpop.xlane.xlu0 %1029 }
 0x580   : > { %vm1032_vm6 = vcmp.lt.f32.partialorder %v1030_v2, 4.0 }
 0x581   : > { %vm1034_vm8 = vmand %vm1032_vm6, %vm849_vm15  ;;  %v1027_v7 = vpop.xlane.xlu2 %1026 }
 0x582   : > { %v2818_v8 = vsel %vm1034_vm8, 1.0, %v2322_v44  ;;  %vm1031_vm9 = vcmp.lt.f32.partialorder %v1027_v7, 4.0  ;;  %v1885_v7 = vld [vmem:[%s3045_s5 + $0x28] sm:$0xff] }
 0x583   : > { %v1080_v10 = vmul.f32 %v2818_v8, %v1078_v4  ;;  %vm1101_vm10 = vcmp.gt.f32.partialorder %v2818_v8, 0.0  ;;  %vm1033_vm12 = vmand %vm1031_vm9, %vm848_vm3  ;;  %vm1411_vm3 = vcmask 523264  }
 0x584   : > { %v2828_v32 = vsel %vm1033_vm12, 1.0, %v2322_v44 }
 0x585   : > { %v1079_v12 = vmul.f32 %v2828_v32, %v1077_v11  ;;  %vm1100_vm15 = vcmp.gt.f32.partialorder %v2828_v32, 0.0  ;;  %v1134_v58 = vmul.f32 %v2818_v8, %v1080_v10  ;;  %v1107_v14 = vsel %vm1101_vm10, %v1080_v10, -3.4028235e+38 }
 0x586   : > { %v1090_v20 = vsel %vm727_vm4, %v1080_v10, 0.0  ;;  %v1109_v56 = vsel %vm727_vm4, %v1107_v14, -inf  ;;  %v1081_v4 = vadd.f32 %v2818_v8, %v2828_v32 }
 0x587   : > { %1895 = vmatmul.msk.f32.vlgmr.msra.gmra.mxu2 %vm727_vm4, %v1079_v12  ;;  %v1136_v15 = vsel %vm727_vm4, %v1134_v58, %v2818_v8  ;;  %v1133_v16 = vmul.f32 %v2828_v32, %v1079_v12  ;;  %v1106_v17 = vsel %vm1100_vm15, %v1079_v12, -3.4028235e+38  ;;  %v1089_v22 = vsel %vm727_vm4, %v1079_v12, 0.0 }
 0x588   : > { %1151 = vmatpush.msrb.mxu1 %v1136_v15  ;;  %v1108_v18 = vsel %vm727_vm4, %v1106_v17, -inf  ;;  %v2848_v30 = vadd.f32 %v1090_v20, %v1089_v22  ;;  %v1082_v9 = vrot.slane %v1081_v4, 4 }
 0x589   : > { %v1135_v23 = vsel %vm727_vm4, %v1133_v16, %v2828_v32  ;;  %v1110_v26 = vmax.f32 %v1108_v18, %v1109_v56  ;;  %v867_v52 = vpop.permute.xlu2 %866 }
 0x58a   : > { %1152 = vmatpush.msrb.mxu1 %v1135_v23  ;;  %v1092_v12 = vrot.slane %v2848_v30, 4 }
 0x58b   : > { %1890 = vmatmul.msk.f32.vlgmr.msrb.gmra.mxu1 %vm610_vm1, %v2543_v5  ;;  %v845_v5 = vadd.f32 %v844_v35, %v843_v48 }
 0x58c   : > { %1423 = vmatpush.msra.mxu1 %v2730_v19  ;;  %v1093_v13 = vadd.f32 %v1092_v12, %v2848_v30 }
 0x58d   : > { %v847_v53 = vmul.f32 %v2046_v50, %v845_v5 }
 0x58e   : > { %1424 = vmatpush.msra.mxu1 %v2738_v24  ;;  %v1094_v20 = vrot.slane %v1093_v13, 2 }
 0x58f   : > { %1896 = vmatmul.msk.f32.gmra.mxu2 %vm727_vm4, %v1080_v10  ;;  %v869_v29 = vsel %vm727_vm4, %v847_v53, %v867_v52  ;;  %v1083_v10 = vadd.f32 %v1082_v9, %v1081_v4 }
 0x590   : > { %1425 = vmatpush.msra.mxu1 %v2744_v28  ;;  %v1095_v16 = vadd.f32 %v1094_v20, %v1093_v13 }
 0x591   : > { %v1084_v11 = vrot.slane %v1083_v10, 2 }
 0x592   : > { %1426 = vmatpush.msra.mxu1 %v2750_v33  ;;  %v1096_v17 = vrot.slane %v1095_v16, 1 }
 0x593   : > { %1891 = vmatmul.msk.f32.gmra.mxu1 %vm610_vm1, %v2547_v6  ;;  %v1111_v6 = vrot.slane %v1110_v26, 4  ;;  %v1085_v34 = vadd.f32 %v1084_v11, %v1083_v10 }
 0x594   : > { %1427 = vmatpush.msra.mxu1 %v2767_v43 }
 0x595   : > { %v1112_v55 = vmax.f32 %v1110_v26, %v1111_v6  ;;  %v1086_v58 = vrot.slane %v1085_v34, 1 }
 0x596   : > { %1428 = vmatpush.msra.mxu1 %v2779_v36 }
 0x597   : > { %v1087_v14 = vadd.f32 %v1086_v58, %v1085_v34 }
 0x598   : > { %1429 = vmatpush.msra.mxu1 %v2791_v27 }
 0x599   : > { %v1088_v49 = vmax.f32 %v1087_v14, 1.0 }
 0x59a   : > { %1430 = vmatpush.msra.mxu1 %v2807_v60 }
 0x59b   : > { %1903 = vmatmul.msk.f32.vlgmr.msra.gmra.mxu1 %vm1411_vm3, %v869_v29 }
 0x59c   : > { %1595 = vmatpush.msrb.mxu1 %v2730_v19  ;;  %v1889_v19 = vld [vmem:[%s3045_s5 + $0x48] sm:$0x1] }
 0x59d   : > { %1892 = vmatpush.msk.msrb.mxu3 %vm663_vm2, %v1889_v19 }
 0x59e   : > { %1596 = vmatpush.msrb.mxu1 %v2738_v24  ;;  %v1888_v24 = vld [vmem:[%s3045_s5 + $0x40] sm:$0xff] }
 0x59f   : > { %1197 = vmatpush.msrb.mxu3 %v1888_v24 }
 0x5a0   : > { %1597 = vmatpush.msrb.mxu1 %v2744_v28 }
 0x5a2   : > { %1598 = vmatpush.msrb.mxu1 %v2750_v33  ;;  %v1887_v33 = vld [vmem:[%s3045_s5 + $0x38] sm:$0xff] }
 0x5a3   : > { %1198 = vmatpush.msrb.mxu3 %v1887_v33 }
 0x5a4   : > { %1599 = vmatpush.msrb.mxu1 %v2767_v43  ;;  %v1113_v43 = vrot.slane %v1112_v55, 2 }
 0x5a6   : > { %1600 = vmatpush.msrb.mxu1 %v2779_v36  ;;  %v1886_v36 = vld [vmem:[%s3045_s5 + $0x30] sm:$0xff]  ;;  %v1114_v57 = vmax.f32 %v1112_v55, %v1113_v43  ;;  %v1237_v55 = vperm.slane %v2557_v21, 2 }
 0x5a7   : > { %1199 = vmatpush.msrb.mxu3 %v1886_v36  ;;  %v1244_v36 = vperm.slane %v2560_v25, 2 }
 0x5a8   : > { %1601 = vmatpush.msrb.mxu1 %v2791_v27 }
 0x5a9   : > { %1200 = vmatpush.msrb.mxu3 %v1885_v7 }
 0x5aa   : > { %1602 = vmatpush.msrb.mxu1 %v2807_v60  ;;  %v1115_v60 = vrot.slane %v1114_v57, 1 }
 0x5ab   : > { %1490 = vmatpush.msra.mxu3 %v2755_v37 }
 0x5ac   : > { %v1116_v0 = vmax.f32 %v1114_v57, %v1115_v60 }
 0x5ad   : > { %1491 = vmatpush.msra.mxu3 %v2761_v38 }
 0x5af   : > { %1492 = vmatpush.msra.mxu3 %v2773_v47 }
 0x5b1   : > { %1493 = vmatpush.msra.mxu3 %v2785_v51  ;;  %v1097_v51 = vadd.f32 %v1096_v17, %v1095_v16 }
 0x608   : > { %v1154_v54 = vpop.f32.mrf.mxu1 }
 0x609   : > { %v1160_v28 = vmax.f32 %v1154_v54, 1.0 }
 0x60a   : > { %v1231_v19 = vpop.f32.mrf.mxu2 }
 0x60b   : > { %2047 = vrcp.f32 %v1160_v28 }
 0x610   : > { %v2886_v27 = vpop.f32.mrf.mxu1 }
 0x611   : > { %v2048_v59 = vpop.eup %2047  ;;  %v1161_v21 = vmax.f32 %v2886_v27, 1.0 }
 0x612   : > { %1166 = vperm.xlu2 %2020, %v2048_v59   ;;  %v1234_v10 = vpop.f32.mrf.mxu2 }
 0x618   : > { %v1432_v63 = vpop.f32.mrf.mxu1 }
 0x619   : > { %v1433_v1 = vadd.f32 %v1432_v63, %v1408_v61 }
 0x61a   : > { %1118 = vrot.lane.b32.xlu2 %v1116_v0, %s2324_s20 }
 0x61b   : > { %v1435_v2 = vadd.f32 %v1433_v1, %v2891_v62 }
 0x61d   : > { %2049 = vtanh.f32 %v1435_v2  ;;  %v1904_v15 = vmul.f32 -1.442695, %v1435_v2 }
 0x61e   : > { %2051 = vrcp.f32 %v1088_v49 }
 0x61f   : > { %2053 = vpow2.f32 %v1904_v15 }
 0x623   : > { %v2050_v3 = vpop.eup %2049 }
 0x624   : > { %1458 = vrot.lane.b32.xlu1 %v2050_v3, %s2325_s11  ;;  %v2052_v47 = vpop.eup %2051 }
 0x625   : > { %v2054_v18 = vpop.eup %2053  ;;  %v1099_v56 = vmul.f32 %v2052_v47, %v1097_v51 }
 0x626   : > { %v1439_v26 = vadd.f32 1.0, %v2054_v18 }
 0x628   : > { %2055 = vrcp.f32 %v1439_v26  ;;  %v1451_v50 = vand.u32 2147483648, %v1439_v26  ;;  %vm1445_vm13 = vweird.f32 %v1439_v26  ;;  %v1449_v5 = vand.u32 2147483647, %v1439_v26 }
 0x62a   : > { %v1452_v53 = vor.u32 1.1754944e-38, %v1451_v50  ;;  %vm1450_vm0 = vcmp.eq.f32.partialorder %v1449_v5, 8.507059e+37 }
 0x62e   : > { %v2056_v30 = vpop.eup %2055 }
 0x62f   : > { %v1441_v31 = vmul.f32 %v2056_v30, %v1439_v26  ;;  %vm1446_vm2 = vweird.f32 %v2056_v30 }
 0x630   : > { %vm1447_vm14 = vmor %vm1445_vm13, %vm1446_vm2 }
 0x631   : > { %v1442_v39 = vsub.f32 1.0, %v1441_v31 }
 0x633   : > { %v1443_v48 = vmul.f32 %v2056_v30, %v1442_v39 }
 0x635   : > { %v1444_v35 = vadd.f32 %v2056_v30, %v1443_v48 }
 0x637   : > { %v1448_v52 = vsel %vm1447_vm14, %v2056_v30, %v1444_v35 }
 0x638   : > { %v1453_v6 = vsel %vm1450_vm0, %v1452_v53, %v1448_v52 }
 0x639   : > { %v1456_v61 = vmul.f32 0.0, %v1453_v6 }
 0x66c   : > { %v1167_v37 = vpop.permute.xlu2 %1166 }
 0x66d   : > { %v1174_v38 = vmul.f32 %v1167_v37, %v1154_v54 }
 0x66f   : > { %1893 = vmatmul.msk.f32.vlgmr.msrb.gmra.mxu3 %vm922_vm5, %v1174_v38 }
 0x674   : > { %v1119_v22 = vpop.permute.xlu2 %1118 }
 0x675   : > { %v1121_v23 = vsel %vm727_vm4, %v1099_v56, %v1119_v22 }
 0x676   : > { %1906 = vmatmul.msk.f32.vlgmr.msrb.gmra.mxu2 %vm1411_vm3, %v1121_v23 }
 0x696   : > { %v1459_v29 = vpop.permute.xlu1 %1458 }
 0x697   : > { %v1461_v54 = vmul.f32 %v1459_v29, %v1453_v6 }
 0x699   : > { %1463 = vrot.lane.b32.xlu1 %v1461_v54, %s2324_s20 }
 0x6f2   : > { %v1202_v24 = vpop.f32.mrf.mxu3 }
 0x6f3   : > { %v1232_v28 = vadd.f32 %v1231_v19, %v1202_v24 }
 0x6f5   : > { %v1238_v33 = vadd.f32 %v1237_v55, %v1232_v28 }
 0x6f7   : > { %v1240_v43 = vmax.f32 %v1238_v33, 0.0 }
 0x6f9   : > { %v2914_v57 = vmul.f32 %v2828_v32, %v1240_v43  ;;  %v1518_v49 = vpop.f32.mrf.mxu2 }
 0x6fb   : > { %v1245_v59 = vmul.f32 %v1244_v36, %v2914_v57 }
 0x6fd   : > { %v1247_v60 = vsel %vm727_vm4, %v1245_v59, 0.0 }
 0x6fe   : > { %1248 = vadd.xlane.f32.xlu2 %v1247_v60 }
 0x70b   : > { %v1464_v63 = vpop.permute.xlu1 %1463 }
 0x70c   : > { %v2918_v0 = vadd.f32 %v1464_v63, %v1456_v61 }
 0x70e   : > { %2057 = vtanh.f32 %v2918_v0 }
 0x70f   : > { %2059 = vrcp.f32 %v1161_v21 }
 0x714   : > { %v2058_v1 = vpop.eup %2057 }
 0x715   : > { %1469 = vrot.lane.b32.xlu1 %v2058_v1, %s2325_s11  ;;  %v2060_v25 = vpop.eup %2059 }
 0x71d   : > { %1171 = vperm.xlu1 %2019, %v2060_v25  }
 0x771   : > { %v1249_v38 = vpop.xlane.xlu2 %1248 }
 0x772   : > { %v1253_v17 = vsel %vm1100_vm15, %v1249_v38, -3.4028235e+38  ;;  %v1901_v21 = vmul.f32 -1.442695, %v1249_v38 }
 0x773   : > { %v1255_v47 = vmul.f32 %v2587_v45, %v1253_v17 }
 0x775   : > { %v1257_v22 = vsel %vm610_vm1, %v1255_v47, 0.0 }
 0x787   : > { %v1470_v2 = vpop.permute.xlu1 %1469 }
 0x788   : > { %v1472_v3 = vmul.f32 %v1470_v2, %v1453_v6 }
 0x78a   : > { %1474 = vrot.lane.b32.xlu1 %v1472_v3, %s2324_s20 }
 0x78f   : > { %v1172_v4 = vpop.permute.xlu1 %1171 }
 0x790   : > { %v1175_v7 = vmul.f32 %v1172_v4, %v2886_v27 }
 0x792   : > { %1894 = vmatmul.msk.f32.gmra.mxu3 %vm922_vm5, %v1175_v7 }
 0x7fc   : > { %v1475_v9 = vpop.permute.xlu1 %1474 }
 0x7fd   : > { %1905 = vmatmul.msk.f32.vlgmr.msra.gmra.mxu3 %vm727_vm4, %v1475_v9 }
 0x815   : > { %v1205_v11 = vpop.f32.mrf.mxu3 }
 0x816   : > { %v1235_v34 = vadd.f32 %v1234_v10, %v1205_v11 }
 0x818   : > { %v1239_v12 = vadd.f32 %v1237_v55, %v1235_v34 }
 0x81a   : > { %v1241_v58 = vmax.f32 %v1239_v12, 0.0 }
 0x81c   : > { %v2928_v13 = vmul.f32 %v2818_v8, %v1241_v58 }
 0x81e   : > { %v1246_v14 = vmul.f32 %v1244_v36, %v2928_v13 }
 0x820   : > { %v1250_v20 = vsel %vm727_vm4, %v1246_v14, 0.0 }
 0x821   : > { %1251 = vadd.xlane.f32.xlu1 %v1250_v20 }
 0x880   : > { %v1495_v27 = vpop.f32.mrf.mxu3 }
 0x881   : > { %v1519_v15 = vadd.f32 %v1518_v49, %v1495_v27 }
 0x883   : > { %v1521_v16 = vadd.f32 %v1519_v15, %v2891_v62 }
 0x885   : > { %2061 = vtanh.f32 %v1521_v16  ;;  %v1907_v5 = vmul.f32 -1.442695, %v1521_v16 }
 0x887   : > { %2063 = vpow2.f32 %v1907_v5 }
 0x88b   : > { %v2062_v37 = vpop.eup %2061 }
 0x88c   : > { %1544 = vrot.lane.b32.xlu0 %v2062_v37, %s2325_s11 }
 0x88d   : > { %v2064_v52 = vpop.eup %2063 }
 0x88e   : > { %v1525_v53 = vadd.f32 1.0, %v2064_v52 }
 0x890   : > { %2065 = vrcp.f32 %v1525_v53  ;;  %v1537_v24 = vand.u32 2147483648, %v1525_v53  ;;  %vm1531_vm2 = vweird.f32 %v1525_v53  ;;  %v1535_v42 = vand.u32 2147483647, %v1525_v53 }
 0x892   : > { %v1538_v33 = vor.u32 1.1754944e-38, %v1537_v24  ;;  %vm1536_vm13 = vcmp.eq.f32.partialorder %v1535_v42, 8.507059e+37 }
 0x894   : > { %v1252_v51 = vpop.xlane.xlu1 %1251 }
 0x895   : > { %v1254_v18 = vsel %vm1101_vm10, %v1252_v51, -3.4028235e+38  ;;  %v1902_v63 = vmul.f32 -1.442695, %v1252_v51 }
 0x896   : > { %v1256_v56 = vmul.f32 %v2590_v46, %v1254_v18  ;;  %v2066_v29 = vpop.eup %2065 }
 0x897   : > { %v1527_v6 = vmul.f32 %v2066_v29, %v1525_v53  ;;  %vm1532_vm12 = vweird.f32 %v2066_v29  ;;  %2067 = vpow2.f32 %v1902_v63 }
 0x898   : > { %v1258_v23 = vsel %vm610_vm1, %v1256_v56, 0.0  ;;  %2069 = vpow2.f32 %v1901_v21 }
 0x899   : > { %v1259_v26 = vadd.f32 %v1258_v23, %v1257_v22  ;;  %v1528_v54 = vsub.f32 1.0, %v1527_v6 }
 0x89b   : > { %v1260_v30 = vrot.slane %v1259_v26, 4  ;;  %v1529_v55 = vmul.f32 %v2066_v29, %v1528_v54 }
 0x89d   : > { %v1261_v31 = vadd.f32 %v1260_v30, %v1259_v26  ;;  %v1530_v19 = vadd.f32 %v2066_v29, %v1529_v55  ;;  %v2068_v3 = vpop.eup %2067 }
 0x89e   : > { %v1299_v40 = vadd.f32 1.0, %v2068_v3  ;;  %v2070_v41 = vpop.eup %2069 }
 0x89f   : > { %v1262_v39 = vrot.slane %v1261_v31, 2  ;;  %v1298_v7 = vadd.f32 1.0, %v2070_v41 }
 0x8a0   : > { %v1326_v27 = vand.u32 2147483648, %v1299_v40  ;;  %v1324_v15 = vand.u32 2147483647, %v1299_v40 }
 0x8a1   : > { %v1263_v48 = vadd.f32 %v1262_v39, %v1261_v31  ;;  %v1309_v47 = vand.u32 2147483647, %v1298_v7 }
 0x8a2   : > { %v1327_v38 = vor.u32 1.1754944e-38, %v1326_v27 }
 0x8a3   : > { %v1264_v35 = vrot.slane %v1263_v48, 1 }
 0x8a5   : > { %v1265_v50 = vadd.f32 %v1264_v35, %v1263_v48 }
 0x8a7   : > { %vm1269_vm5 = vcmp.eq.f32.partialorder %v1265_v50, %v1254_v18  ;;  %vm1267_vm6 = vcmp.gt.f32.partialorder %v1265_v50, %v1254_v18  ;;  %vm1268_vm14 = vcmp.eq.f32.partialorder %v1265_v50, %v1253_v17  ;;  %vm1266_vm0 = vcmp.gt.f32.partialorder %v1265_v50, %v1253_v17 }
 0x8a8   : > { %vm1271_vm8 = vmand %vm1269_vm5, %vm764_vm7  ;;  %v1311_v17 = vand.u32 2147483648, %v1298_v7 }
 0x8a9   : > { %vm1273_vm9 = vmor %vm1267_vm6, %vm1271_vm8 }
 0x8aa   : > { %v1898_v45 = vsel %vm1273_vm9, 1.0, %v2322_v44  ;;  %vm1533_vm7 = vmor %vm1531_vm2, %vm1532_vm12  ;;  %vm1325_vm2 = vcmp.eq.f32.partialorder %v1324_v15, 8.507059e+37  ;;  %v1312_v22 = vor.u32 1.1754944e-38, %v1311_v17 }
 0x8ab   : > { %v1281_v46 = vsel %vm610_vm1, %v1898_v45, 0.0  ;;  %v1534_v28 = vsel %vm1533_vm7, %v2066_v29, %v1530_v19  ;;  %vm1270_vm5 = vmand %vm1268_vm14, %vm763_vm11  ;;  %vm1320_vm11 = vweird.f32 %v1299_v40 }
 0x8ac   : > { %1282 = vadd.xlane.f32.xlu2 %v1281_v46  ;;  %v2947_v36 = vsel %vm1536_vm13, %v1538_v33, %v1534_v28  ;;  %vm1272_vm6 = vmor %vm1266_vm0, %vm1270_vm5  ;;  %vm1305_vm13 = vweird.f32 %v1298_v7  ;;  %vm1310_vm0 = vcmp.eq.f32.partialorder %v1309_v47, 8.507059e+37 }
 0x8ad   : > { %v1897_v60 = vsel %vm1272_vm6, 1.0, %v2322_v44  ;;  %v1542_v1 = vmul.f32 %v2947_v36, %v2918_v0 }
 0x8ae   : > { %v1278_v61 = vsel %vm610_vm1, %v1897_v60, 0.0 }
 0x8fe   : > { %v1545_v43 = vpop.permute.xlu0 %1544 }
 0x8ff   : > { %v1547_v59 = vmul.f32 %v1545_v43, %v2947_v36 }
 0x901   : > { %1549 = vrot.lane.b32.xlu0 %v1547_v59, %s2324_s20 }
 0x91f   : > { %v1283_v20 = vpop.xlane.xlu2 %1282 }
 0x920   : > { %vm1285_vm9 = vcmp.lt.f32.partialorder %v1283_v20, 2.0 }
 0x921   : > { %vm1287_vm7 = vmand %vm1285_vm9, %vm1101_vm10  ;;  %vm1704_vm9 = vcmask 24576  }
 0x922   : > { %v1900_v56 = vsel %vm1287_vm7, 1.0, %v2322_v44 }
 0x923   : > { %vm1354_vm5 = vcmp.gt.f32.partialorder %v1900_v56, 0.0 }
 0x92b   : > { %1279 = vadd.xlane.f32.xlu0 %v1278_v61 }
 0x973   : > { %v1550_v25 = vpop.permute.xlu0 %1549 }
 0x974   : > { %v2958_v2 = vadd.f32 %v1550_v25, %v1542_v1 }
 0x976   : > { %2071 = vtanh.f32 %v2958_v2 }
 0x977   : > { %2073 = vrcp.f32 %v1299_v40 }
 0x978   : > { %2075 = vrcp.f32 %v1298_v7 }
 0x97c   : > { %v2072_v4 = vpop.eup %2071 }
 0x97d   : > { %1555 = vrot.lane.b32.xlu1 %v2072_v4, %s2325_s11  ;;  %v2074_v9 = vpop.eup %2073 }
 0x97e   : > { %v1316_v10 = vmul.f32 %v2074_v9, %v1299_v40  ;;  %v2076_v11 = vpop.eup %2075  ;;  %vm1321_vm1 = vweird.f32 %v2074_v9 }
 0x97f   : > { %v1301_v34 = vmul.f32 %v2076_v11, %v1298_v7  ;;  %vm1322_vm8 = vmor %vm1320_vm11, %vm1321_vm1  ;;  %vm1306_vm12 = vweird.f32 %v2076_v11 }
 0x980   : > { %v1317_v0 = vsub.f32 1.0, %v1316_v10  ;;  %vm1307_vm14 = vmor %vm1305_vm13, %vm1306_vm12 }
 0x981   : > { %v1302_v12 = vsub.f32 1.0, %v1301_v34 }
 0x982   : > { %v1318_v58 = vmul.f32 %v2074_v9, %v1317_v0 }
 0x983   : > { %v1303_v49 = vmul.f32 %v2076_v11, %v1302_v12 }
 0x984   : > { %v1319_v14 = vadd.f32 %v2074_v9, %v1318_v58 }
 0x985   : > { %v1304_v37 = vadd.f32 %v2076_v11, %v1303_v49 }
 0x986   : > { %v1323_v16 = vsel %vm1322_vm8, %v2074_v9, %v1319_v14 }
 0x987   : > { %v1328_v51 = vsel %vm1325_vm2, %v1327_v38, %v1323_v16  ;;  %v1308_v18 = vsel %vm1307_vm14, %v2076_v11, %v1304_v37 }
 0x988   : > { %v1331_v23 = vmul.f32 %v1328_v51, %v2928_v13  ;;  %v1313_v26 = vsel %vm1310_vm0, %v1312_v22, %v1308_v18 }
 0x989   : > { %v1330_v39 = vmul.f32 %v1313_v26, %v2914_v57 }
 0x98a   : > { %v1333_v30 = vmul.f32 %v1900_v56, %v1331_v23 }
 0x98c   : > { %v1360_v48 = vsel %vm1354_vm5, %v1333_v30, -3.4028235e+38  ;;  %v1343_v45 = vsel %vm727_vm4, %v1333_v30, 0.0 }
 0x98d   : > { %v1362_v52 = vsel %vm727_vm4, %v1360_v48, -inf  ;;  %v1645_v48 = vld [vmem:[#allocation10] sm:$0xff] }
 0x99e   : > { %v1280_v31 = vpop.xlane.xlu0 %1279 }
 0x99f   : > { %vm1284_vm6 = vcmp.lt.f32.partialorder %v1280_v31, 2.0  ;;  %v1648_v31 = vld [vmem:[#allocation10 + $0x18] sm:$0xff] }
 0x9a0   : > { %vm1286_vm10 = vmand %vm1284_vm6, %vm1100_vm15  ;;  %1667 = vmatpush.msrb.mxu3 %v1648_v31 }
 0x9a1   : > { %v1899_v8 = vsel %vm1286_vm10, 1.0, %v2322_v44 }
 0x9a2   : > { %v1332_v35 = vmul.f32 %v1899_v8, %v1330_v39  ;;  %v1334_v50 = vadd.f32 %v1900_v56, %v1899_v8  ;;  %vm1353_vm1 = vcmp.gt.f32.partialorder %v1899_v8, 0.0  ;;  %v1647_v39 = vld [vmem:[#allocation10 + $0x10] sm:$0xff]  ;;  %v1646_v8 = vld [vmem:[#allocation10 + $0x8] sm:$0xff] }
 0x9a3   : > { %1668 = vmatpush.msrb.mxu3 %v1647_v39 }
 0x9a4   : > { %v1335_v13 = vrot.slane %v1334_v50, 4  ;;  %v1342_v46 = vsel %vm727_vm4, %v1332_v35, 0.0  ;;  %v1359_v5 = vsel %vm1353_vm1, %v1332_v35, -3.4028235e+38 }
 0x9a5   : > { %v1344_v53 = vadd.f32 %v1343_v45, %v1342_v46  ;;  %v1361_v57 = vsel %vm727_vm4, %v1359_v5, -inf  ;;  %1669 = vmatpush.msrb.mxu3 %v1646_v8  ;;  %v1677_v46 = vld [vmem:[%s3053_s13 + $0x8] sm:$0xff]  ;;  %v1676_v5 = vld [vmem:[%s3053_s13] sm:$0xff] }
 0x9a6   : > { %v1336_v29 = vadd.f32 %v1335_v13, %v1334_v50  ;;  %v1363_v32 = vmax.f32 %v1361_v57, %v1362_v52  ;;  %v1678_v13 = vld [vmem:[%s3053_s13 + $0x10] sm:$0xff]  ;;  %v1649_v52 = vld [vmem:[%s3052_s12] sm:$0x1] }
 0x9a7   : > { %v1345_v6 = vrot.slane %v1344_v53, 4  ;;  %1670 = vmatpush.msrb.mxu3 %v1645_v48 }
 0x9a8   : > { %v1337_v54 = vrot.slane %v1336_v29, 2  ;;  %v1364_v44 = vrot.slane %v1363_v32, 4 }
 0x9a9   : > { %v1346_v55 = vadd.f32 %v1345_v6, %v1344_v53 }
 0x9aa   : > { %v1338_v19 = vadd.f32 %v1337_v54, %v1336_v29  ;;  %v1365_v24 = vmax.f32 %v1363_v32, %v1364_v44  ;;  %v1680_v32 = vld [vmem:[%s3080_s2] sm:$0x1] }
 0x9ab   : > { %v1347_v42 = vrot.slane %v1346_v55, 2 }
 0x9ac   : > { %v1339_v28 = vrot.slane %v1338_v19, 1  ;;  %v1366_v33 = vrot.slane %v1365_v24, 2 }
 0x9ad   : > { %v1348_v60 = vadd.f32 %v1347_v42, %v1346_v55 }
 0x9ae   : > { %v1340_v43 = vadd.f32 %v1339_v28, %v1338_v19  ;;  %v1367_v59 = vmax.f32 %v1365_v24, %v1366_v33 }
 0x9af   : > { %v1349_v1 = vrot.slane %v1348_v60, 1 }
 0x9b0   : > { %v1341_v61 = vmax.f32 %v1340_v43, 1.0  ;;  %v1368_v63 = vrot.slane %v1367_v59, 1 }
 0x9b1   : > { %v1350_v25 = vadd.f32 %v1349_v1, %v1348_v60 }
 0x9b2   : > { %2077 = vrcp.f32 %v1341_v61  ;;  %v1369_v21 = vmax.f32 %v1367_v59, %v1368_v63 }
 0x9b4   : > { %1371 = vrot.lane.b32.xlu2 %v1369_v21, %s2324_s20 }
 0x9b8   : > { %v2078_v3 = vpop.eup %2077 }
 0x9b9   : > { %v1352_v40 = vmul.f32 %v2078_v3, %v1350_v25 }
 0x9ef   : > { %v1556_v41 = vpop.permute.xlu1 %1555 }
 0x9f0   : > { %v1558_v4 = vmul.f32 %v1556_v41, %v2947_v36 }
 0x9f2   : > { %1560 = vrot.lane.b32.xlu0 %v1558_v4, %s2324_s20 }
 0xa0e   : > { %v1372_v7 = vpop.permute.xlu2 %1371 }
 0xa0f   : > { %v1374_v9 = vsel %vm727_vm4, %v1352_v40, %v1372_v7 }
 0xa10   : > { %1909 = vmatmul.msk.f32.vlgmr.msrb.gmra.mxu1 %vm1411_vm3, %v1374_v9 }
 0xa64   : > { %v1561_v10 = vpop.permute.xlu0 %1560 }
 0xa65   : > { %1908 = vmatmul.msk.f32.vlgmr.msrb.gmra.mxu0 %vm727_vm4, %v1561_v10 }
 0xa8d   : > { %v1604_v11 = vpop.f32.mrf.mxu1 }
 0xae2   : > { %v1581_v34 = vpop.f32.mrf.mxu0 }
 0xae3   : > { %v1605_v0 = vadd.f32 %v1604_v11, %v1581_v34 }
 0xae5   : > { %v1607_v12 = vadd.f32 %v1605_v0, %v2891_v62 }
 0xae7   : > { %2079 = vtanh.f32 %v1607_v12  ;;  %v1910_v36 = vmul.f32 -1.442695, %v1607_v12 }
 0xae9   : > { %2081 = vpow2.f32 %v1910_v36 }
 0xaed   : > { %v2080_v58 = vpop.eup %2079 }
 0xaee   : > { %1630 = vrot.lane.b32.xlu1 %v2080_v58, %s2325_s11 }
 0xaef   : > { %v2082_v14 = vpop.eup %2081 }
 0xaf0   : > { %v1611_v20 = vadd.f32 1.0, %v2082_v14 }
 0xaf2   : > { %2083 = vrcp.f32 %v1611_v20  ;;  %v1623_v38 = vand.u32 2147483648, %v1611_v20  ;;  %vm1617_vm3 = vweird.f32 %v1611_v20  ;;  %v1621_v17 = vand.u32 2147483647, %v1611_v20 }
 0xaf4   : > { %v1624_v47 = vor.u32 1.1754944e-38, %v1623_v38  ;;  %vm1622_vm8 = vcmp.eq.f32.partialorder %v1621_v17, 8.507059e+37 }
 0xaf8   : > { %v2084_v49 = vpop.eup %2083 }
 0xaf9   : > { %v1613_v27 = vmul.f32 %v2084_v49, %v1611_v20  ;;  %vm1618_vm15 = vweird.f32 %v2084_v49 }
 0xafa   : > { %vm1619_vm11 = vmor %vm1617_vm3, %vm1618_vm15 }
 0xafb   : > { %v1614_v15 = vsub.f32 1.0, %v1613_v27 }
 0xafd   : > { %v1615_v16 = vmul.f32 %v2084_v49, %v1614_v15 }
 0xaff   : > { %v1616_v37 = vadd.f32 %v2084_v49, %v1615_v16 }
 0xb01   : > { %v1620_v62 = vsel %vm1619_vm11, %v2084_v49, %v1616_v37 }
 0xb02   : > { %v1625_v18 = vsel %vm1622_vm8, %v1624_v47, %v1620_v62 }
 0xb03   : > { %v1628_v22 = vmul.f32 %v1625_v18, %v2958_v2  ;;  %v1679_v2 = vld [vmem:[%s3053_s13 + $0x18] sm:$0xff] }
 0xb04   : > { %1696 = vmatpush.msra.mxu0 %v1679_v2 }
 0xb06   : > { %1697 = vmatpush.msra.mxu0 %v1678_v13 }
 0xb08   : > { %1698 = vmatpush.msra.mxu0 %v1677_v46 }
 0xb0a   : > { %1699 = vmatpush.msra.mxu0 %v1676_v5 }
 0xb60   : > { %v1631_v51 = vpop.permute.xlu1 %1630 }
 0xb61   : > { %v1633_v56 = vmul.f32 %v1631_v51, %v1625_v18 }
 0xb63   : > { %1635 = vrot.lane.b32.xlu2 %v1633_v56, %s2324_s20 }
 0xbbd   : > { %v1636_v23 = vpop.permute.xlu2 %1635 }
 0xbbe   : > { %v1638_v26 = vadd.f32 %v1636_v23, %v1628_v22 }
 0xbc0   : > { %2085 = vtanh.f32 %v1638_v26 }
 0xbc6   : > { %v2086_v30 = vpop.eup %2085 }
 0xbc7   : > { %1641 = vrot.lane.b32.xlu1 %v2086_v30, %s2325_s11 }
 0xc39   : > { %v1642_v35 = vpop.permute.xlu1 %1641 }
 0xc3a   : > { %v1644_v50 = vmul.f32 %v1642_v35, %v1625_v18 }
 0xc3c   : > { %1651 = vrot.lane.b32.xlu2 %v1644_v50, %s2324_s20  ;;  %s2251_s20 = sshra.s32 %s1720_s25, 4  ;;  %s2252_s20 = int_to_ptr.hbm [resolvable:$true] %s2251_s20 }
 0xc3d   : > { %s2253_s30 = scalar_lea.hbm %s2252_s20, 1  ;;  %p2258_p2 = scmp.lt.s32.totalorder %s2252_s20, %s3055_s15 }
 0xc3e   : > { %p2254_p1 = scmp.ne.s32.totalorder %s2252_s20, %s2253_s30  ;;  %p2259_p10 = scmp.lt.s32.totalorder %s2257_s18, %s2253_s30 }
 0xc40   : > { %p2255_p4 = pnand %p2254_p1, %p2490_p3  ;;  %p2260_p11 = por %p2259_p10, %p2258_p2 }
 0xc42   : > { %p2256_p9 = pneg %p2255_p4 }
 0xc44   : > { %p2261_p12 = pnand %p2260_p11, %p2256_p9 }
 0xc96   : > { %v1652_v45 = vpop.permute.xlu2 %1651 }
 0xc97   : > { %1911 = vmatmul.msk.f32.vlgmr.msrb.gmra.mxu3 %vm727_vm4, %v1652_v45 }
 0xd1a   : > { %v1672_v53 = vpop.f32.mrf.mxu3 }
 0xd1b   : > { %v1673_v57 = vadd.f32 %v1672_v53, %v1649_v52 }
 0xd1d   : > { %v1675_v29 = vmax.f32 %v1673_v57, 0.0 }
 0xd1f   : > { %1912 = vmatmul.msk.f32.vlgmr.msra.gmra.mxu0 %vm727_vm4, %v1675_v29 }
 0xd9c   : > { %v1701_v6 = vpop.f32.mrf.mxu0 }
 0xd9d   : > { %v1702_v54 = vadd.f32 %v1701_v6, %v1680_v32 }
 0xd9f   : > { %1705 = vst.msk [vmem:[%s590_s28] sm:$0x1] %vm1704_vm9, %v1702_v54 }
 0xda0   : > { %2264 = shalt.err (!%p2261_p12)
}
 0xda1   : > { %1939 = dma.vmem_to_hbm [thread:$0]  (%p2490_p3), %s1718_s16, 16, %s1720_s25, %s1707_s23  }
 0xda2 PF: > { %s3081_s14 = sld [smem:[#allocation16_spill]]  ;;  %p3083_p13 = scmp.ge.s32.totalorder %s2311_s21, 2 }
 0xda4   : > { %p1959_p0 = pnand %p3083_p13, %p2441_p6 }
 0xda6   : > { %p1960_p5 = pneg %p1959_p0 }
 0xda8   : > { %s1731_s24 = sand.u32 1, %s3081_s14  }
 0xda9   : > { %s1732_s27 = scalar_lea.sflag [#allocation4], %s1731_s24 }
 0xdaa   : > { %2294 = dma.done.wait (%p1960_p5), %s1732_s27, 16  }
 0xdab   : > { %2296 = vsyncadd (%p1960_p5), %s1732_s27, 4294967280  ;;  %s3084_s2 = sld [smem:[#allocation17_spill]]  ;;  %p30_p7 = scmp.ge.s32.totalorder %s2480_s17, 4  }
 0xdac   : > { %s3085_s20 = sld [smem:[#allocation19_spill]]  ;;  %s3086_s18 = smov %s2303_s19 }
 0xdad   : > { %s3088_s21 = smov %s2480_s17  ;;  %32 = sbr.rel (!%p30_p7) target bundleno = 13 (0xd), region = 146 }
 0xdb1   : > { %s3087_s19 = smov %s3084_s2 }
 0xdb2   :  { %1737 = vsyncpa [#allocation3], 1 }
 0xdb3   :  { %1739 = vsyncpa [#allocation3 + $0x1], 1 }
 0xdb4   :  { %1740 = vsyncpa [#allocation6], 1 }
 0xdb5   :  { %1741 = vsyncpa [#allocation9], 1 }
 0xdb6   :  { %1742 = vsyncpa [#allocation4], 1 }
 0xdb7   :  { %1744 = vsyncpa [#allocation4 + $0x1], 1 }

</bundles_post_ra>
